<compile_context>
chip_gen: v7x
topology: tpu7x:2x2x1
jax: 0.10.0
libtpu: 0.0.40
codegen_flags: <defaults>
</compile_context>

<pallas_src>
import functools

import jax
import jax.numpy as jnp
from jax.experimental import pallas as pl
from jax.experimental.pallas import tpu as pltpu


def _round_up(x, m):
    return (x + m - 1) // m * m


def _cdiv(a, b):
    return (a + b - 1) // b


def _vmem_capacity_bytes():
    # Generation-aware VMEM cap (64 MiB/TC on v7x, 128 MiB on v5e/v6e).
    try:
        return int(pltpu.get_tpu_info().vmem_capacity_bytes)
    except Exception:
        return 64 << 20  # conservative fallback (v7x-sized)


def _clever_kernel(
    emb_c_ref, mask_c_ref, inv_c_ref,                    # claims encoder stream
    emb_e_ref, mask_e_ref, inv_e_ref,                    # evidence encoder stream
    wp_c_ref, bp_c_ref, wp_e_ref, bp_e_ref,              # pooler params (resident)
    w1c_ref, b1c_ref, w2c_ref, b2c_ref,                  # mlp1 params  (resident)
    w1e_ref, b1e_ref, w2e_ref, b2e_ref,                  # mlp2 params  (resident)
    const_ref,                                           # scalar constant (SMEM)
    out_ref,                                             # packed [tb, 4*nc_pad]
    acc_c_ref, acc_e_ref,                                # f32 [tb, F] accumulators
    *, nc_pad,
):
    s = pl.program_id(1)

    @pl.when(s == 0)
    def _():
        acc_c_ref[...] = jnp.zeros_like(acc_c_ref)
        acc_e_ref[...] = jnp.zeros_like(acc_e_ref)

    # Masked partial sums over this sequence chunk.  The 0/1 mask multiply is
    # exact in bf16; the reduction accumulates in f32 chunk-by-chunk, so the
    # old full-tile f32 upcast never materializes.
    acc_c_ref[...] += jnp.sum(emb_c_ref[...] * mask_c_ref[...], axis=1,
                              dtype=jnp.float32)
    acc_e_ref[...] += jnp.sum(emb_e_ref[...] * mask_e_ref[...], axis=1,
                              dtype=jnp.float32)

    @pl.when(s == pl.num_programs(1) - 1)
    def _():
        def pooler(acc, inv, wp_ref, bp_ref):
            pooled = (acc * inv).astype(jnp.bfloat16)     # exact masked mean
            return jnp.tanh(
                jnp.dot(pooled, wp_ref[...],
                        preferred_element_type=jnp.float32) + bp_ref[...])

        def mlp(x, w1_ref, b1_ref, w2_ref, b2_ref):
            h = jnp.maximum(
                jnp.dot(x.astype(jnp.bfloat16), w1_ref[...],
                        preferred_element_type=jnp.float32) + b1_ref[...], 0.0)
            return jnp.maximum(
                jnp.dot(h.astype(jnp.bfloat16), w2_ref[...],
                        preferred_element_type=jnp.float32) + b2_ref[...], 0.0)

        claims = pooler(acc_c_ref[...], inv_c_ref[...], wp_c_ref, bp_c_ref)
        evidences = pooler(acc_e_ref[...], inv_e_ref[...], wp_e_ref, bp_e_ref)

        res_claim = mlp(claims, w1c_ref, b1c_ref, w2c_ref, b2c_ref)       # [tb, nc_pad]
        res_fusion = mlp(evidences, w1e_ref, b1e_ref, w2e_ref, b2e_ref)   # [tb, nc_pad]

        c = const_ref[0, 0]
        res_final = jnp.log(1e-8 + jax.nn.sigmoid(res_claim + res_fusion))
        # .detach() only affects gradients; forward value is identical.
        cf_res = jnp.log(1e-8 + jax.nn.sigmoid(res_claim + c))
        tie = res_final - cf_res

        # Lane-dense packed output: every field sits at a 128-aligned lane
        # offset, so every store is an unmasked vst and writeback is one wide DMA.
        out_ref[:, 0 * nc_pad:1 * nc_pad] = res_claim
        out_ref[:, 1 * nc_pad:2 * nc_pad] = res_final
        out_ref[:, 2 * nc_pad:3 * nc_pad] = cf_res
        out_ref[:, 3 * nc_pad:4 * nc_pad] = tie


def init_params(key, vocab, nfeat, nclass):
    ks = jax.random.split(key, 10)

    def linear(k, fan_in, fan_out):
        bound = 1.0 / jnp.sqrt(jnp.float32(fan_in))
        kw, kb = jax.random.split(k)
        w = jax.random.uniform(kw, (fan_in, fan_out), jnp.float32, -bound, bound)
        b = jax.random.uniform(kb, (1, fan_out), jnp.float32, -bound, bound)
        return w, b

    wp_c, bp_c = linear(ks[0], nfeat, nfeat)
    wp_e, bp_e = linear(ks[1], nfeat, nfeat)
    w1c, b1c = linear(ks[2], nfeat, nfeat)
    w2c, b2c = linear(ks[3], nfeat, nclass)
    w1e, b1e = linear(ks[4], nfeat, nfeat)
    w2e, b2e = linear(ks[5], nfeat, nclass)

    return dict(
        tok_emb1=jax.random.normal(ks[6], (vocab, nfeat), jnp.float32) * 0.02,
        seg_emb1=jax.random.normal(ks[7], (2, nfeat), jnp.float32) * 0.02,
        tok_emb2=jax.random.normal(ks[8], (vocab, nfeat), jnp.float32) * 0.02,
        seg_emb2=jax.random.normal(ks[9], (2, nfeat), jnp.float32) * 0.02,
        wp_c=wp_c, bp_c=bp_c, wp_e=wp_e, bp_e=bp_e,
        w1c=w1c, b1c=b1c, w2c=w2c, b2c=b2c,
        w1e=w1e, b1e=b1e, w2e=w2e, b2e=b2e,
        constant=jnp.zeros((), jnp.float32),   # nn.Parameter(torch.tensor(0.0))
    )


def clever_forward(params, data, *, batch_tile=256, seq_chunk=64):
    input_ids, input_mask, segment_ids, labels = data   # labels unused in forward
    ids_c, mask_c, seg_c = input_ids[:, 0, :], input_mask[:, 0, :], segment_ids[:, 0, :]
    ids_e, mask_e, seg_e = input_ids[:, 1, :], input_mask[:, 1, :], segment_ids[:, 1, :]

    B, S = ids_c.shape
    F = params["tok_emb1"].shape[1]
    nclass = params["w2c"].shape[1]
    nc_pad = _round_up(nclass, 128)

    # TODO(synk): pretrained 'BERT-Pair' encoders cannot be loaded in-script;
    # replaced by deterministic embedding + masked-mean pooling + dense pooler.
    # TODO(synk): the token-embedding gather stays in XLA: a per-token
    # make_async_copy row gather (tb*S tiny DMAs per grid step) would be DMA
    # issue-latency bound; tables are cast to bf16 so the fused gather+add only
    # moves bf16 bytes through HBM.
    emb_c = (params["tok_emb1"].astype(jnp.bfloat16)[ids_c]
             + params["seg_emb1"].astype(jnp.bfloat16)[seg_c])          # [B,S,F] bf16
    emb_e = (params["tok_emb2"].astype(jnp.bfloat16)[ids_e]
             + params["seg_emb2"].astype(jnp.bfloat16)[seg_e])

    # Exact per-row mean reciprocal, computed once in f32 in the wrapper so
    # the kernel needs no division at all.
    cnt_c = jnp.maximum(jnp.sum(mask_c.astype(jnp.float32), -1, keepdims=True), 1.0)
    cnt_e = jnp.maximum(jnp.sum(mask_e.astype(jnp.float32), -1, keepdims=True), 1.0)
    inv_c = 1.0 / cnt_c                                                   # [B,1] f32
    inv_e = 1.0 / cnt_e

    # bf16 0/1 masks (exact), shaped [B,S,1] so sequence chunks stay
    # sublane-aligned and broadcast directly against the embedding chunk.
    mask_c_b = mask_c.astype(jnp.bfloat16)[:, :, None]
    mask_e_b = mask_e.astype(jnp.bfloat16)[:, :, None]

    # ---- sequence chunking -------------------------------------------------
    sc = min(seq_chunk, S)
    if sc < S:
        sc = max(8, (sc // 8) * 8)            # chunk must be sublane-aligned
    s_pad = _round_up(S, sc)

    # ---- generation-aware VMEM budget -> batch tile -------------------------
    vmem_cap = _vmem_capacity_bytes()
    budget = max(vmem_cap - (8 << 20), 8 << 20)
    # per-batch-row VMEM: two bf16 encoder streams (double-buffered) + f32
    # reduction temporaries + accumulators + packed output (double-buffered).
    per_row = (2 * 2 * sc * (F + 1) * 2
               + 2 * sc * F * 4
               + 2 * F * 4
               + 2 * 4 * nc_pad * 4)
    tb_budget = max(8, int((budget // 2) // per_row) // 8 * 8)

    tb = min(batch_tile, tb_budget)
    # Guarantee >=2 tiles on the parallel batch axis when B allows it, so the
    # two v7x TensorCores both get work (no effect on single-TC v5e/v6e).
    tb = max(8, min(tb, _round_up(_cdiv(B, 2), 8)))
    b_pad = _round_up(B, tb)

    # ---- padding -------------------------------------------------------------
    def pad_bs(x):
        return jnp.pad(x, ((0, b_pad - x.shape[0]), (0, s_pad - x.shape[1]))
                       + ((0, 0),) * (x.ndim - 2))

    emb_c = pad_bs(emb_c)
    emb_e = pad_bs(emb_e)
    mask_c_b = pad_bs(mask_c_b)
    mask_e_b = pad_bs(mask_e_b)
    inv_c = jnp.pad(inv_c, ((0, b_pad - B), (0, 0)))
    inv_e = jnp.pad(inv_e, ((0, b_pad - B), (0, 0)))

    # Zero-pad the classifier weights/biases to a lane-dense output width and
    # cast matmul weights to bf16 (full-rate MXU path, half the resident VMEM).
    def pad_classifier(w, b):
        w_p = jnp.zeros((w.shape[0], nc_pad), jnp.float32).at[:, :nclass].set(w)
        b_p = jnp.zeros((1, nc_pad), jnp.float32).at[:, :nclass].set(b)
        return w_p, b_p

    w2c_p, b2c_p = pad_classifier(params["w2c"], params["b2c"])
    w2e_p, b2e_p = pad_classifier(params["w2e"], params["b2e"])

    bf16 = lambda w: w.astype(jnp.bfloat16)
    weights = (
        bf16(params["wp_c"]), params["bp_c"], bf16(params["wp_e"]), params["bp_e"],
        bf16(params["w1c"]), params["b1c"], bf16(w2c_p), b2c_p,
        bf16(params["w1e"]), params["b1e"], bf16(w2e_p), b2e_p,
    )

    # ---- grid & specs --------------------------------------------------------
    grid = (b_pad // tb, s_pad // sc)

    emb_spec = pl.BlockSpec((tb, sc, F), lambda b, s: (b, s, 0))
    mask_spec = pl.BlockSpec((tb, sc, 1), lambda b, s: (b, s, 0))
    inv_spec = pl.BlockSpec((tb, 1), lambda b, s: (b, 0))
    # TODO(synk): the resident weights are still double-buffered by the default
    # pipeline; single-buffering them (pl.Buffered(1) / full-VMEM memory_space)
    # would free their (already bf16-halved) footprint counted in the budget.
    weight_specs = [pl.BlockSpec(w.shape, lambda b, s: (0, 0)) for w in weights]
    const_spec = pl.BlockSpec((1, 1), lambda b, s: (0, 0),
                              memory_space=pltpu.MemorySpace.SMEM)
    in_specs = ([emb_spec, mask_spec, inv_spec,
                 emb_spec, mask_spec, inv_spec]
                + weight_specs + [const_spec])
    out_spec = pl.BlockSpec((tb, 4 * nc_pad), lambda b, s: (b, 0))

    scratch_shapes = [pltpu.VMEM((tb, F), jnp.float32),
                      pltpu.VMEM((tb, F), jnp.float32)]

    # ---- VMEM limit: count streams, temporaries, weights, output ------------
    weight_bytes = sum(int(w.size) * w.dtype.itemsize for w in weights)
    stream_bytes = 2 * 2 * tb * sc * (F + 1) * 2        # bf16, double-buffered
    temp_bytes = 2 * tb * sc * F * 4 + 2 * tb * F * 4   # f32 reduce temps + accumulators
    out_bytes = 2 * tb * 4 * nc_pad * 4
    inv_bytes = 2 * 2 * tb * 128 * 4                    # (tb,1) blocks pad to 128 lanes
    needed = (stream_bytes + temp_bytes + out_bytes + inv_bytes
              + 2 * weight_bytes + (4 << 20))
    vmem_limit = min(needed, vmem_cap - (8 << 20))
    vmem_limit = int(max(vmem_limit, min(16 << 20, vmem_cap // 2)))

    kernel = functools.partial(_clever_kernel, nc_pad=nc_pad)

    out = pl.pallas_call(
        kernel,
        out_shape=jax.ShapeDtypeStruct((b_pad, 4 * nc_pad), jnp.float32),
        grid=grid,
        in_specs=in_specs,
        out_specs=out_spec,
        scratch_shapes=scratch_shapes,
        compiler_params=pltpu.CompilerParams(
            dimension_semantics=("parallel", "arbitrary"),
            vmem_limit_bytes=vmem_limit,
        ),
    )(emb_c, mask_c_b, inv_c, emb_e, mask_e_b, inv_e, *weights,
      params["constant"].reshape(1, 1))

    res_claim = out[:B, 0 * nc_pad:0 * nc_pad + nclass]
    res_final = out[:B, 1 * nc_pad:1 * nc_pad + nclass]
    cf_res = out[:B, 2 * nc_pad:2 * nc_pad + nclass]
    tie = out[:B, 3 * nc_pad:3 * nc_pad + nclass]
    return res_claim, res_final, cf_res, tie


def clever_reference(params, data):
    """Pure-JAX reference with identical math (incl. bf16 embedding/weight quant)."""
    input_ids, input_mask, segment_ids, labels = data
    ids_c, mask_c, seg_c = input_ids[:, 0, :], input_mask[:, 0, :], segment_ids[:, 0, :]
    ids_e, mask_e, seg_e = input_ids[:, 1, :], input_mask[:, 1, :], segment_ids[:, 1, :]

    def q(x):  # bf16 quantization of matmul inputs, f32 accumulation (mirrors MXU)
        return x.astype(jnp.bfloat16).astype(jnp.float32)

    def encode(tok_emb, seg_emb, wp, bp, ids, mask, seg):
        emb = (tok_emb.astype(jnp.bfloat16)[ids]
               + seg_emb.astype(jnp.bfloat16)[seg]).astype(jnp.float32)
        m = mask.astype(jnp.float32)
        cnt = jnp.maximum(jnp.sum(m, axis=1, keepdims=True), 1.0)
        pooled = jnp.sum(emb * m[:, :, None], axis=1) * (1.0 / cnt)
        return jnp.tanh(q(pooled) @ q(wp) + bp)

    def mlp(x, w1, b1, w2, b2):
        h = jnp.maximum(q(x) @ q(w1) + b1, 0.0)
        return jnp.maximum(q(h) @ q(w2) + b2, 0.0)

    claims = encode(params["tok_emb1"], params["seg_emb1"],
                    params["wp_c"], params["bp_c"], ids_c, mask_c, seg_c)
    evidences = encode(params["tok_emb2"], params["seg_emb2"],
                       params["wp_e"], params["bp_e"], ids_e, mask_e, seg_e)

    res_claim = mlp(claims, params["w1c"], params["b1c"], params["w2c"], params["b2c"])
    res_fusion = mlp(evidences, params["w1e"], params["b1e"], params["w2e"], params["b2e"])
    res_final = jnp.log(1e-8 + jax.nn.sigmoid(res_claim + res_fusion))
    cf_res = jnp.log(1e-8 + jax.nn.sigmoid(res_claim + params["constant"]))
    tie = res_final - cf_res
    return res_claim, res_final, cf_res, tie


if __name__ == "__main__":
    key = jax.random.PRNGKey(0)
    B, S, V, nfeat, nclass = 2, 16, 64, 32, 4
    k_ids, k_mask, k_seg, k_params = jax.random.split(key, 4)

    input_ids = jax.random.randint(k_ids, (B, 2, S), 0, V, dtype=jnp.int32)
    input_mask = (jax.random.uniform(k_mask, (B, 2, S)) > 0.2).astype(jnp.int32)
    input_mask = input_mask.at[:, :, 0].set(1)   # at least one real token per row
    segment_ids = jax.random.randint(k_seg, (B, 2, S), 0, 2, dtype=jnp.int32)
    labels = jnp.zeros((B,), jnp.int32)

    params = init_params(k_params, V, nfeat, nclass)
    data = (input_ids, input_mask, segment_ids, labels)

    # seq_chunk=8 -> two sequence chunks at S=16, exercising the accumulator path.
    outs = jax.block_until_ready(clever_forward(params, data, seq_chunk=8))
    refs = clever_reference(params, data)
    for o, r in zip(outs, refs):
        assert o.shape == (B, nclass) and o.dtype == jnp.float32
        err = float(jnp.max(jnp.abs(o - r)))
        assert jnp.allclose(o, r, atol=3e-3, rtol=3e-3), err

    print("KERNEL_OK")
</pallas_src>

<mosaic_0001>
module attributes {stable_mosaic.version = 11 : i64} {
  func.func @_clever_kernel(%arg0: i32, %arg1: i32, %arg2: memref<8x8x32xbf16, #tpu.memory_space<vmem>>, %arg3: memref<8x8x1xbf16, #tpu.memory_space<vmem>>, %arg4: memref<8x1xf32, #tpu.memory_space<vmem>>, %arg5: memref<8x8x32xbf16, #tpu.memory_space<vmem>>, %arg6: memref<8x8x1xbf16, #tpu.memory_space<vmem>>, %arg7: memref<8x1xf32, #tpu.memory_space<vmem>>, %arg8: memref<32x32xbf16, #tpu.memory_space<vmem>>, %arg9: memref<1x32xf32, #tpu.memory_space<vmem>>, %arg10: memref<32x32xbf16, #tpu.memory_space<vmem>>, %arg11: memref<1x32xf32, #tpu.memory_space<vmem>>, %arg12: memref<32x32xbf16, #tpu.memory_space<vmem>>, %arg13: memref<1x32xf32, #tpu.memory_space<vmem>>, %arg14: memref<32x128xbf16, #tpu.memory_space<vmem>>, %arg15: memref<1x128xf32, #tpu.memory_space<vmem>>, %arg16: memref<32x32xbf16, #tpu.memory_space<vmem>>, %arg17: memref<1x32xf32, #tpu.memory_space<vmem>>, %arg18: memref<32x128xbf16, #tpu.memory_space<vmem>>, %arg19: memref<1x128xf32, #tpu.memory_space<vmem>>, %arg20: memref<1x1xf32, #tpu.memory_space<smem>>, %arg21: memref<8x512xf32, #tpu.memory_space<vmem>>, %arg22: memref<8x32xf32, #tpu.memory_space<vmem>>, %arg23: memref<8x32xf32, #tpu.memory_space<vmem>>) attributes {dimension_semantics = [#tpu.dimension_semantics<parallel>, #tpu.dimension_semantics<arbitrary>], iteration_bounds = array<i64: 1, 2>, scalar_prefetch = 0 : i64, scratch_operands = 2 : i64, tpu.core_type = #tpu.core_type<tc>, window_params = [{transform_indices = @transform_0, window_bounds = array<i64: 8, 8, 32>}, {transform_indices = @transform_1, window_bounds = array<i64: 8, 8, 1>}, {transform_indices = @transform_2, window_bounds = array<i64: 8, 1>}, {transform_indices = @transform_3, window_bounds = array<i64: 8, 8, 32>}, {transform_indices = @transform_4, window_bounds = array<i64: 8, 8, 1>}, {transform_indices = @transform_5, window_bounds = array<i64: 8, 1>}, {pipeline_mode = #tpu.pipeline_mode<synchronous>, transform_indices = @transform_6, window_bounds = array<i64: 32, 32>}, {pipeline_mode = #tpu.pipeline_mode<synchronous>, transform_indices = @transform_7, window_bounds = array<i64: 1, 32>}, {pipeline_mode = #tpu.pipeline_mode<synchronous>, transform_indices = @transform_8, window_bounds = array<i64: 32, 32>}, {pipeline_mode = #tpu.pipeline_mode<synchronous>, transform_indices = @transform_9, window_bounds = array<i64: 1, 32>}, {pipeline_mode = #tpu.pipeline_mode<synchronous>, transform_indices = @transform_10, window_bounds = array<i64: 32, 32>}, {pipeline_mode = #tpu.pipeline_mode<synchronous>, transform_indices = @transform_11, window_bounds = array<i64: 1, 32>}, {pipeline_mode = #tpu.pipeline_mode<synchronous>, transform_indices = @transform_12, window_bounds = array<i64: 32, 128>}, {pipeline_mode = #tpu.pipeline_mode<synchronous>, transform_indices = @transform_13, window_bounds = array<i64: 1, 128>}, {pipeline_mode = #tpu.pipeline_mode<synchronous>, transform_indices = @transform_14, window_bounds = array<i64: 32, 32>}, {pipeline_mode = #tpu.pipeline_mode<synchronous>, transform_indices = @transform_15, window_bounds = array<i64: 1, 32>}, {pipeline_mode = #tpu.pipeline_mode<synchronous>, transform_indices = @transform_16, window_bounds = array<i64: 32, 128>}, {pipeline_mode = #tpu.pipeline_mode<synchronous>, transform_indices = @transform_17, window_bounds = array<i64: 1, 128>}, {transform_indices = @transform_18, window_bounds = array<i64: 1, 1>}, {transform_indices = @transform_19, window_bounds = array<i64: 8, 512>}]} {
    %c0_i32 = arith.constant 0 : i32
    %0 = arith.cmpi eq, %arg1, %c0_i32 : i32
    %1 = arith.extui %0 : i1 to i32
    %c0_i32_0 = arith.constant 0 : i32
    %2 = arith.cmpi ne, %1, %c0_i32_0 : i32
    scf.if %2 {
      %cst_22 = arith.constant 0.000000e+00 : f32
      %24 = vector.broadcast %cst_22 : f32 to vector<8x32xf32>
      %c0_23 = arith.constant 0 : index
      %c0_24 = arith.constant 0 : index
      %25 = vector.load %arg22[%c0_23, %c0_24] : memref<8x32xf32, #tpu.memory_space<vmem>>, vector<8x32xf32>
      tpu.vector_store %arg22[%c0_23, %c0_24], %24 {strides = array<i32>} : memref<8x32xf32, #tpu.memory_space<vmem>>, vector<8x32xf32>,
      %cst_25 = arith.constant 0.000000e+00 : f32
      %26 = vector.broadcast %cst_25 : f32 to vector<8x32xf32>
      %c0_26 = arith.constant 0 : index
      %c0_27 = arith.constant 0 : index
      %27 = vector.load %arg23[%c0_26, %c0_27] : memref<8x32xf32, #tpu.memory_space<vmem>>, vector<8x32xf32>
      tpu.vector_store %arg23[%c0_26, %c0_27], %26 {strides = array<i32>} : memref<8x32xf32, #tpu.memory_space<vmem>>, vector<8x32xf32>,
    } else {
    }
    %c0 = arith.constant 0 : index
    %c0_1 = arith.constant 0 : index
    %3 = vector.load %arg22[%c0, %c0_1] : memref<8x32xf32, #tpu.memory_space<vmem>>, vector<8x32xf32>
    %c0_2 = arith.constant 0 : index
    %c0_3 = arith.constant 0 : index
    %c0_4 = arith.constant 0 : index
    %4 = vector.load %arg2[%c0_2, %c0_3, %c0_4] : memref<8x8x32xbf16, #tpu.memory_space<vmem>>, vector<8x8x32xbf16>
    %c0_5 = arith.constant 0 : index
    %c0_6 = arith.constant 0 : index
    %c0_7 = arith.constant 0 : index
    %5 = vector.load %arg3[%c0_5, %c0_6, %c0_7] : memref<8x8x1xbf16, #tpu.memory_space<vmem>>, vector<8x8x1xbf16>
    %6 = vector.broadcast %5 : vector<8x8x1xbf16> to vector<8x8x32xbf16>
    %7 = arith.mulf %4, %6 : vector<8x8x32xbf16>
    %8 = arith.extf %7 : vector<8x8x32xbf16> to vector<8x8x32xf32>
    %cst = arith.constant dense<0.000000e+00> : vector<8x32xf32>
    %9 = vector.multi_reduction <add>, %8, %cst [1] : vector<8x8x32xf32> to vector<8x32xf32>
    %10 = arith.addf %3, %9 : vector<8x32xf32>
    %c0_8 = arith.constant 0 : index
    %c0_9 = arith.constant 0 : index
    %11 = vector.load %arg22[%c0_8, %c0_9] : memref<8x32xf32, #tpu.memory_space<vmem>>, vector<8x32xf32>
    tpu.vector_store %arg22[%c0_8, %c0_9], %10 {strides = array<i32>} : memref<8x32xf32, #tpu.memory_space<vmem>>, vector<8x32xf32>,
    %c0_10 = arith.constant 0 : index
    %c0_11 = arith.constant 0 : index
    %12 = vector.load %arg23[%c0_10, %c0_11] : memref<8x32xf32, #tpu.memory_space<vmem>>, vector<8x32xf32>
    %c0_12 = arith.constant 0 : index
    %c0_13 = arith.constant 0 : index
    %c0_14 = arith.constant 0 : index
    %13 = vector.load %arg5[%c0_12, %c0_13, %c0_14] : memref<8x8x32xbf16, #tpu.memory_space<vmem>>, vector<8x8x32xbf16>
    %c0_15 = arith.constant 0 : index
    %c0_16 = arith.constant 0 : index
    %c0_17 = arith.constant 0 : index
    %14 = vector.load %arg6[%c0_15, %c0_16, %c0_17] : memref<8x8x1xbf16, #tpu.memory_space<vmem>>, vector<8x8x1xbf16>
    %15 = vector.broadcast %14 : vector<8x8x1xbf16> to vector<8x8x32xbf16>
    %16 = arith.mulf %13, %15 : vector<8x8x32xbf16>
    %17 = arith.extf %16 : vector<8x8x32xbf16> to vector<8x8x32xf32>
    %cst_18 = arith.constant dense<0.000000e+00> : vector<8x32xf32>
    %18 = vector.multi_reduction <add>, %17, %cst_18 [1] : vector<8x8x32xf32> to vector<8x32xf32>
    %19 = arith.addf %12, %18 : vector<8x32xf32>
    %c0_19 = arith.constant 0 : index
    %c0_20 = arith.constant 0 : index
    %20 = vector.load %arg23[%c0_19, %c0_20] : memref<8x32xf32, #tpu.memory_space<vmem>>, vector<8x32xf32>
    tpu.vector_store %arg23[%c0_19, %c0_20], %19 {strides = array<i32>} : memref<8x32xf32, #tpu.memory_space<vmem>>, vector<8x32xf32>,
    %c1_i32 = arith.constant 1 : i32
    %21 = arith.cmpi eq, %arg1, %c1_i32 : i32
    %22 = arith.extui %21 : i1 to i32
    %c0_i32_21 = arith.constant 0 : i32
    %23 = arith.cmpi ne, %22, %c0_i32_21 : i32
    scf.if %23 {
      %c0_22 = arith.constant 0 : index
      %c0_23 = arith.constant 0 : index
      %24 = vector.load %arg22[%c0_22, %c0_23] : memref<8x32xf32, #tpu.memory_space<vmem>>, vector<8x32xf32>
      %c0_24 = arith.constant 0 : index
      %c0_25 = arith.constant 0 : index
      %25 = vector.load %arg4[%c0_24, %c0_25] : memref<8x1xf32, #tpu.memory_space<vmem>>, vector<8x1xf32>
      %26 = vector.broadcast %25 : vector<8x1xf32> to vector<8x32xf32>
      %27 = arith.mulf %24, %26 : vector<8x32xf32>
      %28 = arith.truncf %27 : vector<8x32xf32> to vector<8x32xbf16>
      %c0_26 = arith.constant 0 : index
      %c0_27 = arith.constant 0 : index
      %29 = vector.load %arg8[%c0_26, %c0_27] : memref<32x32xbf16, #tpu.memory_space<vmem>>, vector<32x32xbf16>
      %cst_28 = arith.constant dense<0.000000e+00> : vector<8x32xf32>
      %30 = tpu.matmul %28, %29, %cst_28 {dimension_numbers = #tpu.dot_dimension_numbers<[1], [0], [0], [1], [0, 0, 1, 1], [], []>} : vector<8x32xbf16>, vector<32x32xbf16>, vector<8x32xf32> -> vector<8x32xf32>
      %c0_29 = arith.constant 0 : index
      %c0_30 = arith.constant 0 : index
      %31 = vector.load %arg9[%c0_29, %c0_30] : memref<1x32xf32, #tpu.memory_space<vmem>>, vector<1x32xf32>
      %32 = vector.broadcast %31 : vector<1x32xf32> to vector<8x32xf32>
      %33 = arith.addf %30, %32 : vector<8x32xf32>
      %34 = math.tanh %33 : vector<8x32xf32>
      %c0_31 = arith.constant 0 : index
      %c0_32 = arith.constant 0 : index
      %35 = vector.load %arg23[%c0_31, %c0_32] : memref<8x32xf32, #tpu.memory_space<vmem>>, vector<8x32xf32>
      %c0_33 = arith.constant 0 : index
      %c0_34 = arith.constant 0 : index
      %36 = vector.load %arg7[%c0_33, %c0_34] : memref<8x1xf32, #tpu.memory_space<vmem>>, vector<8x1xf32>
      %37 = vector.broadcast %36 : vector<8x1xf32> to vector<8x32xf32>
      %38 = arith.mulf %35, %37 : vector<8x32xf32>
      %39 = arith.truncf %38 : vector<8x32xf32> to vector<8x32xbf16>
      %c0_35 = arith.constant 0 : index
      %c0_36 = arith.constant 0 : index
      %40 = vector.load %arg10[%c0_35, %c0_36] : memref<32x32xbf16, #tpu.memory_space<vmem>>, vector<32x32xbf16>
      %cst_37 = arith.constant dense<0.000000e+00> : vector<8x32xf32>
      %41 = tpu.matmul %39, %40, %cst_37 {dimension_numbers = #tpu.dot_dimension_numbers<[1], [0], [0], [1], [0, 0, 1, 1], [], []>} : vector<8x32xbf16>, vector<32x32xbf16>, vector<8x32xf32> -> vector<8x32xf32>
      %c0_38 = arith.constant 0 : index
      %c0_39 = arith.constant 0 : index
      %42 = vector.load %arg11[%c0_38, %c0_39] : memref<1x32xf32, #tpu.memory_space<vmem>>, vector<1x32xf32>
      %43 = vector.broadcast %42 : vector<1x32xf32> to vector<8x32xf32>
      %44 = arith.addf %41, %43 : vector<8x32xf32>
      %45 = math.tanh %44 : vector<8x32xf32>
      %46 = arith.truncf %34 : vector<8x32xf32> to vector<8x32xbf16>
      %c0_40 = arith.constant 0 : index
      %c0_41 = arith.constant 0 : index
      %47 = vector.load %arg12[%c0_40, %c0_41] : memref<32x32xbf16, #tpu.memory_space<vmem>>, vector<32x32xbf16>
      %cst_42 = arith.constant dense<0.000000e+00> : vector<8x32xf32>
      %48 = tpu.matmul %46, %47, %cst_42 {dimension_numbers = #tpu.dot_dimension_numbers<[1], [0], [0], [1], [0, 0, 1, 1], [], []>} : vector<8x32xbf16>, vector<32x32xbf16>, vector<8x32xf32> -> vector<8x32xf32>
      %c0_43 = arith.constant 0 : index
      %c0_44 = arith.constant 0 : index
      %49 = vector.load %arg13[%c0_43, %c0_44] : memref<1x32xf32, #tpu.memory_space<vmem>>, vector<1x32xf32>
      %50 = vector.broadcast %49 : vector<1x32xf32> to vector<8x32xf32>
      %51 = arith.addf %48, %50 : vector<8x32xf32>
      %cst_45 = arith.constant 0.000000e+00 : f32
      %52 = vector.broadcast %cst_45 : f32 to vector<8x32xf32>
      %53 = arith.maximumf %51, %52 : vector<8x32xf32>
      %54 = arith.truncf %53 : vector<8x32xf32> to vector<8x32xbf16>
      %c0_46 = arith.constant 0 : index
      %c0_47 = arith.constant 0 : index
      %55 = vector.load %arg14[%c0_46, %c0_47] : memref<32x128xbf16, #tpu.memory_space<vmem>>, vector<32x128xbf16>
      %cst_48 = arith.constant dense<0.000000e+00> : vector<8x128xf32>
      %56 = tpu.matmul %54, %55, %cst_48 {dimension_numbers = #tpu.dot_dimension_numbers<[1], [0], [0], [1], [0, 0, 1, 1], [], []>} : vector<8x32xbf16>, vector<32x128xbf16>, vector<8x128xf32> -> vector<8x128xf32>
      %c0_49 = arith.constant 0 : index
      %c0_50 = arith.constant 0 : index
      %57 = vector.load %arg15[%c0_49, %c0_50] : memref<1x128xf32, #tpu.memory_space<vmem>>, vector<1x128xf32>
      %58 = vector.broadcast %57 : vector<1x128xf32> to vector<8x128xf32>
      %59 = arith.addf %56, %58 : vector<8x128xf32>
      %cst_51 = arith.constant 0.000000e+00 : f32
      %60 = vector.broadcast %cst_51 : f32 to vector<8x128xf32>
      %61 = arith.maximumf %59, %60 : vector<8x128xf32>
      %62 = arith.truncf %45 : vector<8x32xf32> to vector<8x32xbf16>
      %c0_52 = arith.constant 0 : index
      %c0_53 = arith.constant 0 : index
      %63 = vector.load %arg16[%c0_52, %c0_53] : memref<32x32xbf16, #tpu.memory_space<vmem>>, vector<32x32xbf16>
      %cst_54 = arith.constant dense<0.000000e+00> : vector<8x32xf32>
      %64 = tpu.matmul %62, %63, %cst_54 {dimension_numbers = #tpu.dot_dimension_numbers<[1], [0], [0], [1], [0, 0, 1, 1], [], []>} : vector<8x32xbf16>, vector<32x32xbf16>, vector<8x32xf32> -> vector<8x32xf32>
      %c0_55 = arith.constant 0 : index
      %c0_56 = arith.constant 0 : index
      %65 = vector.load %arg17[%c0_55, %c0_56] : memref<1x32xf32, #tpu.memory_space<vmem>>, vector<1x32xf32>
      %66 = vector.broadcast %65 : vector<1x32xf32> to vector<8x32xf32>
      %67 = arith.addf %64, %66 : vector<8x32xf32>
      %cst_57 = arith.constant 0.000000e+00 : f32
      %68 = vector.broadcast %cst_57 : f32 to vector<8x32xf32>
      %69 = arith.maximumf %67, %68 : vector<8x32xf32>
      %70 = arith.truncf %69 : vector<8x32xf32> to vector<8x32xbf16>
      %c0_58 = arith.constant 0 : index
      %c0_59 = arith.constant 0 : index
      %71 = vector.load %arg18[%c0_58, %c0_59] : memref<32x128xbf16, #tpu.memory_space<vmem>>, vector<32x128xbf16>
      %cst_60 = arith.constant dense<0.000000e+00> : vector<8x128xf32>
      %72 = tpu.matmul %70, %71, %cst_60 {dimension_numbers = #tpu.dot_dimension_numbers<[1], [0], [0], [1], [0, 0, 1, 1], [], []>} : vector<8x32xbf16>, vector<32x128xbf16>, vector<8x128xf32> -> vector<8x128xf32>
      %c0_61 = arith.constant 0 : index
      %c0_62 = arith.constant 0 : index
      %73 = vector.load %arg19[%c0_61, %c0_62] : memref<1x128xf32, #tpu.memory_space<vmem>>, vector<1x128xf32>
      %74 = vector.broadcast %73 : vector<1x128xf32> to vector<8x128xf32>
      %75 = arith.addf %72, %74 : vector<8x128xf32>
      %cst_63 = arith.constant 0.000000e+00 : f32
      %76 = vector.broadcast %cst_63 : f32 to vector<8x128xf32>
      %77 = arith.maximumf %75, %76 : vector<8x128xf32>
      %c0_64 = arith.constant 0 : index
      %c0_65 = arith.constant 0 : index
      %78 = memref.load %arg20[%c0_64, %c0_65] : memref<1x1xf32, #tpu.memory_space<smem>>
      %79 = arith.addf %61, %77 : vector<8x128xf32>
      %80 = arith.negf %79 : vector<8x128xf32>
      %81 = math.exp %80 : vector<8x128xf32>
      %cst_66 = arith.constant 1.000000e+00 : f32
      %82 = vector.broadcast %cst_66 : f32 to vector<8x128xf32>
      %83 = arith.addf %82, %81 : vector<8x128xf32>
      %84 = arith.divf %82, %83 : vector<8x128xf32>
      %cst_67 = arith.constant 9.99999993E-9 : f32
      %85 = vector.broadcast %cst_67 : f32 to vector<8x128xf32>
      %86 = arith.addf %85, %84 : vector<8x128xf32>
      %87 = math.log %86 : vector<8x128xf32>
      %88 = vector.broadcast %78 : f32 to vector<8x128xf32>
      %89 = arith.addf %61, %88 : vector<8x128xf32>
      %90 = arith.negf %89 : vector<8x128xf32>
      %91 = math.exp %90 : vector<8x128xf32>
      %cst_68 = arith.constant 1.000000e+00 : f32
      %92 = vector.broadcast %cst_68 : f32 to vector<8x128xf32>
      %93 = arith.addf %92, %91 : vector<8x128xf32>
      %94 = arith.divf %92, %93 : vector<8x128xf32>
      %cst_69 = arith.constant 9.99999993E-9 : f32
      %95 = vector.broadcast %cst_69 : f32 to vector<8x128xf32>
      %96 = arith.addf %95, %94 : vector<8x128xf32>
      %97 = math.log %96 : vector<8x128xf32>
      %98 = arith.subf %87, %97 : vector<8x128xf32>
      %c0_70 = arith.constant 0 : index
      %c0_71 = arith.constant 0 : index
      %99 = vector.load %arg21[%c0_70, %c0_71] : memref<8x512xf32, #tpu.memory_space<vmem>>, vector<8x128xf32>
      tpu.vector_store %arg21[%c0_70, %c0_71], %61 {strides = array<i32>} : memref<8x512xf32, #tpu.memory_space<vmem>>, vector<8x128xf32>,
      %c0_72 = arith.constant 0 : index
      %c128 = arith.constant 128 : index
      %100 = vector.load %arg21[%c0_72, %c128] : memref<8x512xf32, #tpu.memory_space<vmem>>, vector<8x128xf32>
      tpu.vector_store %arg21[%c0_72, %c128], %87 {strides = array<i32>} : memref<8x512xf32, #tpu.memory_space<vmem>>, vector<8x128xf32>,
      %c0_73 = arith.constant 0 : index
      %c256 = arith.constant 256 : index
      %101 = vector.load %arg21[%c0_73, %c256] : memref<8x512xf32, #tpu.memory_space<vmem>>, vector<8x128xf32>
      tpu.vector_store %arg21[%c0_73, %c256], %97 {strides = array<i32>} : memref<8x512xf32, #tpu.memory_space<vmem>>, vector<8x128xf32>,
      %c0_74 = arith.constant 0 : index
      %c384 = arith.constant 384 : index
      %102 = vector.load %arg21[%c0_74, %c384] : memref<8x512xf32, #tpu.memory_space<vmem>>, vector<8x128xf32>
      tpu.vector_store %arg21[%c0_74, %c384], %98 {strides = array<i32>} : memref<8x512xf32, #tpu.memory_space<vmem>>, vector<8x128xf32>,
    } else {
    }
    return
  }
  func.func @transform_0(%arg0: i32, %arg1: i32) -> (i32, i32, i32) {
    %c0_i32 = arith.constant 0 : i32
    %c0_i32_0 = arith.constant 0 : i32
    return %arg0, %arg1, %c0_i32 : i32, i32, i32
  }
  func.func @transform_1(%arg0: i32, %arg1: i32) -> (i32, i32, i32) {
    %c0_i32 = arith.constant 0 : i32
    %c0_i32_0 = arith.constant 0 : i32
    return %arg0, %arg1, %c0_i32 : i32, i32, i32
  }
  func.func @transform_2(%arg0: i32, %arg1: i32) -> (i32, i32) {
    %c0_i32 = arith.constant 0 : i32
    %c0_i32_0 = arith.constant 0 : i32
    return %arg0, %c0_i32 : i32, i32
  }
  func.func @transform_3(%arg0: i32, %arg1: i32) -> (i32, i32, i32) {
    %c0_i32 = arith.constant 0 : i32
    %c0_i32_0 = arith.constant 0 : i32
    return %arg0, %arg1, %c0_i32 : i32, i32, i32
  }
  func.func @transform_4(%arg0: i32, %arg1: i32) -> (i32, i32, i32) {
    %c0_i32 = arith.constant 0 : i32
    %c0_i32_0 = arith.constant 0 : i32
    return %arg0, %arg1, %c0_i32 : i32, i32, i32
  }
  func.func @transform_5(%arg0: i32, %arg1: i32) -> (i32, i32) {
    %c0_i32 = arith.constant 0 : i32
    %c0_i32_0 = arith.constant 0 : i32
    return %arg0, %c0_i32 : i32, i32
  }
  func.func @transform_6(%arg0: i32, %arg1: i32) -> (i32, i32) {
    %c0_i32 = arith.constant 0 : i32
    %c0_i32_0 = arith.constant 0 : i32
    %c0_i32_1 = arith.constant 0 : i32
    return %c0_i32, %c0_i32_0 : i32, i32
  }
  func.func @transform_7(%arg0: i32, %arg1: i32) -> (i32, i32) {
    %c0_i32 = arith.constant 0 : i32
    %c0_i32_0 = arith.constant 0 : i32
    %c0_i32_1 = arith.constant 0 : i32
    return %c0_i32, %c0_i32_0 : i32, i32
  }
  func.func @transform_8(%arg0: i32, %arg1: i32) -> (i32, i32) {
    %c0_i32 = arith.constant 0 : i32
    %c0_i32_0 = arith.constant 0 : i32
    %c0_i32_1 = arith.constant 0 : i32
    return %c0_i32, %c0_i32_0 : i32, i32
  }
  func.func @transform_9(%arg0: i32, %arg1: i32) -> (i32, i32) {
    %c0_i32 = arith.constant 0 : i32
    %c0_i32_0 = arith.constant 0 : i32
    %c0_i32_1 = arith.constant 0 : i32
    return %c0_i32, %c0_i32_0 : i32, i32
  }
  func.func @transform_10(%arg0: i32, %arg1: i32) -> (i32, i32) {
    %c0_i32 = arith.constant 0 : i32
    %c0_i32_0 = arith.constant 0 : i32
    %c0_i32_1 = arith.constant 0 : i32
    return %c0_i32, %c0_i32_0 : i32, i32
  }
  func.func @transform_11(%arg0: i32, %arg1: i32) -> (i32, i32) {
    %c0_i32 = arith.constant 0 : i32
    %c0_i32_0 = arith.constant 0 : i32
    %c0_i32_1 = arith.constant 0 : i32
    return %c0_i32, %c0_i32_0 : i32, i32
  }
  func.func @transform_12(%arg0: i32, %arg1: i32) -> (i32, i32) {
    %c0_i32 = arith.constant 0 : i32
    %c0_i32_0 = arith.constant 0 : i32
    %c0_i32_1 = arith.constant 0 : i32
    return %c0_i32, %c0_i32_0 : i32, i32
  }
  func.func @transform_13(%arg0: i32, %arg1: i32) -> (i32, i32) {
    %c0_i32 = arith.constant 0 : i32
    %c0_i32_0 = arith.constant 0 : i32
    %c0_i32_1 = arith.constant 0 : i32
    return %c0_i32, %c0_i32_0 : i32, i32
  }
  func.func @transform_14(%arg0: i32, %arg1: i32) -> (i32, i32) {
    %c0_i32 = arith.constant 0 : i32
    %c0_i32_0 = arith.constant 0 : i32
    %c0_i32_1 = arith.constant 0 : i32
    return %c0_i32, %c0_i32_0 : i32, i32
  }
  func.func @transform_15(%arg0: i32, %arg1: i32) -> (i32, i32) {
    %c0_i32 = arith.constant 0 : i32
    %c0_i32_0 = arith.constant 0 : i32
    %c0_i32_1 = arith.constant 0 : i32
    return %c0_i32, %c0_i32_0 : i32, i32
  }
  func.func @transform_16(%arg0: i32, %arg1: i32) -> (i32, i32) {
    %c0_i32 = arith.constant 0 : i32
    %c0_i32_0 = arith.constant 0 : i32
    %c0_i32_1 = arith.constant 0 : i32
    return %c0_i32, %c0_i32_0 : i32, i32
  }
  func.func @transform_17(%arg0: i32, %arg1: i32) -> (i32, i32) {
    %c0_i32 = arith.constant 0 : i32
    %c0_i32_0 = arith.constant 0 : i32
    %c0_i32_1 = arith.constant 0 : i32
    return %c0_i32, %c0_i32_0 : i32, i32
  }
  func.func @transform_18(%arg0: i32, %arg1: i32) -> (i32, i32) {
    %c0_i32 = arith.constant 0 : i32
    %c0_i32_0 = arith.constant 0 : i32
    %c0_i32_1 = arith.constant 0 : i32
    return %c0_i32, %c0_i32_0 : i32, i32
  }
  func.func @transform_19(%arg0: i32, %arg1: i32) -> (i32, i32) {
    %c0_i32 = arith.constant 0 : i32
    %c0_i32_0 = arith.constant 0 : i32
    return %arg0, %c0_i32 : i32, i32
  }
}

</mosaic_0001>

<bundles_post_ra>
// kernel: tpu_custom_call.1
= control target key start
LH: loop header
LB: loop body
LE: loop exit
PB: predicated region body
PF: predicated region fallthrough
CT: control target
= control target key end

     0   :  { %s3010_s0 = inlined_call_operand.vmem [shape: bf16[8,16,32], index: 0, kind: input, shape index: {}]   ;;  %s3011_s1 = inlined_call_operand.vmem [shape: bf16[8,16,1], index: 1, kind: input, shape index: {}]   ;;  %s3012_s2 = inlined_call_operand.vmem [shape: f32[8,1], index: 2, kind: input, shape index: {}]   ;;  %s3013_s3 = inlined_call_operand.vmem [shape: bf16[8,16,32], index: 3, kind: input, shape index: {}]   ;;  %s3014_s4 = inlined_call_operand.vmem [shape: bf16[8,16,1], index: 4, kind: input, shape index: {}]   ;;  %s3015_s5 = inlined_call_operand.vmem [shape: f32[8,1], index: 5, kind: input, shape index: {}]   ;;  %s3016_s6 = inlined_call_operand.vmem [shape: bf16[32,32], index: 6, kind: input, shape index: {}]   ;;  %s3017_s7 = inlined_call_operand.vmem [shape: f32[1,32], index: 7, kind: input, shape index: {}]   ;;  %s3018_s8 = inlined_call_operand.vmem [shape: bf16[32,32], index: 8, kind: input, shape index: {}]   ;;  %s3019_s9 = inlined_call_operand.vmem [shape: f32[1,32], index: 9, kind: input, shape index: {}]   ;;  %s3020_s10 = inlined_call_operand.vmem [shape: bf16[32,32], index: 10, kind: input, shape index: {}]   ;;  %s3021_s11 = inlined_call_operand.hbm [shape: f32[1,32], index: 11, kind: input, shape index: {}]   ;;  %s3022_s12 = inlined_call_operand.vmem [shape: bf16[32,128], index: 12, kind: input, shape index: {}]   ;;  %s3023_s13 = inlined_call_operand.hbm [shape: f32[1,128], index: 13, kind: input, shape index: {}]   ;;  %s3024_s14 = inlined_call_operand.vmem [shape: bf16[32,32], index: 14, kind: input, shape index: {}]   ;;  %s3025_s15 = inlined_call_operand.vmem [shape: f32[1,32], index: 15, kind: input, shape index: {}]   ;;  %s3026_s16 = inlined_call_operand.hbm [shape: bf16[32,128], index: 16, kind: input, shape index: {}]   ;;  %s3027_s17 = inlined_call_operand.vmem [shape: f32[1,128], index: 17, kind: input, shape index: {}]   ;;  %s3028_s18 = inlined_call_operand.<no memory space> [shape: f32[1,1], index: 18, kind: input, shape index: {}]   ;;  %s3029_s19 = inlined_call_operand.hbm [shape: f32[8,512], index: 19, kind: output, shape index: {}]  }
   0x1   :  { %3037 = sst [smem:[#allocation21_spill]] %s3010_s0 }
   0x2   :  { %3038 = sst [smem:[#allocation22_spill]] %s3011_s1 }
   0x3   :  { %3039 = sst [smem:[#allocation23_spill]] %s3012_s2 }
   0x4   :  { %3040 = sst [smem:[#allocation24_spill]] %s3013_s3 }
   0x5   :  { %3041 = sst [smem:[#allocation25_spill]] %s3019_s9 }
   0x6   :  { %3042 = sst [smem:[#allocation26_spill]] %s3023_s13 }
   0x7   :  { %3043 = sst [smem:[#allocation27_spill]] %s3024_s14 }
   0x8   :  { %3044 = sst [smem:[#allocation28_spill]] %s3025_s15 }
   0x9   :  { %3045 = sst [smem:[#allocation29_spill]] %s3027_s17 }
   0xa   :  { %3046 = sst [smem:[#allocation30_spill]] %s3029_s19 }
   0xb   :  { %24 = sst [smem:[#allocation4]] %s3028_s18 }
   0xc   :  { %25 = vsyncpa [#allocation10], 0 }
   0xd   :  { %26 = vsyncpa [#allocation13], 0 }
   0xe   :  { %27 = vsyncpa [#allocation11], 0  ;;  %s2623_s20 = smov 0   ;;  %s2625_s21 = smov 0  }
   0xf   :  { %s2627_s1 = smov 0   ;;  %s2629_s22 = smov 0  }
  0x10   :  { %s2631_s2 = smov 0  }
  0x11 LB: > { %s3031_s18 = sadd.s32 4294967295, %s2506_s2   ;;  %s42_s23 = sadd.s32 1, %s2502_s22  ;;  %s2506_s2 = sphi %s2631_s2, %s33_s2   ;;  %s2502_s22 = sphi %s2629_s22, %s3078_s22   ;;  %s2498_s1 = sphi %s2627_s1, %s3077_s1   ;;  %s2494_s21 = sphi %s2625_s21, %s3076_s21   ;;  %s2490_s20 = sphi %s2623_s20, %s3075_s20  }
  0x12   : > { %p43_p0 = scmp.ge.s32.totalorder %s42_s23, 2  ;;  %s54_s24 = sadd.s32 1, %s2494_s21 }
  0x13   : > { %p61_p1 = scmp.ne.s32.totalorder %s2494_s21, %s2490_s20  ;;  %p62_p2 = scmp.eq.s32.totalorder %s2506_s2, 0 }
  0x14   : > { %s3080_s23 = smov (%p43_p0, %s42_s23), 0  ;;  %p2108_p4 = scmp.ge.s32.totalorder %s2506_s2, 1 }
  0x15   : > { %3047 = sst [smem:[#allocation19_spill]] %s3080_s23  ;;  %p2656_p3 = por %p62_p2, %p61_p1 }
  0x16   : > { %s50_s3 = ssub.s32 %s2502_s22, %s3080_s23  ;;  %p513_p5 = scmp.lt.s32.totalorder %s2506_s2, 3 }
  0x17   : > { %s3048_s25 = scalar_select %p2656_p3, 1, 0 }
  0x18   : > { %p52_p6 = scmp.eq.s32.totalorder %s50_s3, 0  ;;  %p2664_p7 = pnand %p2108_p4, %p513_p5 }
  0x19   : > { %p2670_p8 = scmp.eq.s32.totalorder %s3031_s18, 0  ;;  %s2508_s29 = smov [#allocation12]  }
  0x1a   : > { %s3049_s26 = scalar_select %p2664_p7, 1, 0 }
  0x1b   : > { %s3050_s27 = scalar_select %p2670_p8, 1, 0 }
  0x1c   : > { %s2675_s28 = scalar_select %p52_p6, %s2494_s21, %s54_s24  }
  0x1d   : > { %p2245_p9 = pneg %p2664_p7  ;;  %s569_s0 = sshll.u32 %s2508_s29, 4  ;;  %s570_s0 = int_to_ptr.vmem [resolvable:$true] %s569_s0 }
  0x1e   : > { %3051 = sst [smem:[#allocation20_spill]] %s2675_s28  ;;  %s2509_s3 = smov [#allocation9]  }
  0x1f   : > { %p2681_p10 = pnand %p2670_p8, %p2245_p9  ;;  %s555_s23 = sshll.u32 %s2509_s3, 4  ;;  %s556_s23 = int_to_ptr.vmem [resolvable:$true] %s555_s23 }
  0x20   : > { %s3053_s13 = sld [smem:[#allocation26_spill]] }
  0x21   : > { %p2693_p12 = pneg %p2681_p10 }
  0x26   : > { %s2346_s17 = scalar_lea.hbm %s3053_s13, 16 }
  0x27   : > { %p2347_p11 = scmp.ne.s32.totalorder %s3053_s13, %s2346_s17  ;;  %p2353_p1 = scmp.lt.u32.totalorder %s2346_s17, %s3053_s13 }
  0x29   : > { %p2349_p13 = pnand %p2693_p12, %p2347_p11 }
  0x2b   : > { %p2350_p0 = pneg %p2349_p13 }
  0x2d   : > { %p2355_p2 = pnand %p2353_p1, %p2350_p0 }
  0x2f   : > { %2358 = shalt.err (!%p2355_p2)
}
  0x30   : > { %s2359_s19 = scalar_lea.vmem %s570_s0, 16  ;;  %s2366_s15 = scalar_lea.vmem %s570_s0, 32 }
  0x31   : > { %p2360_p4 = scmp.ne.s32.totalorder %s570_s0, %s2359_s19  ;;  %p2367_p9 = scmp.lt.s32.totalorder %s570_s0, %s570_s0 }
  0x32   : > { %p2368_p8 = scmp.lt.s32.totalorder %s2366_s15, %s2359_s19 }
  0x33   : > { %p2362_p5 = pnand %p2360_p4, %p2693_p12 }
  0x34   : > { %p2369_p7 = por %p2368_p8, %p2367_p9 }
  0x35   : > { %p2363_p6 = pneg %p2362_p5 }
  0x37   : > { %p2370_p3 = pnand %p2369_p7, %p2363_p6 }
  0x39   : > { %2373 = shalt.err (!%p2370_p3)
}
  0x3a   : > { %2251 = dma.hbm_to_vmem [thread:$0]  (!%p2681_p10), %s3053_s13, 16, %s570_s0, [#allocation13]  }
  0x3b   : > { %s2374_s28 = scalar_lea.hbm %s3021_s11, 16 }
  0x3c   : > { %p2375_p11 = scmp.ne.s32.totalorder %s3021_s11, %s2374_s28  ;;  %p2381_p3 = scmp.lt.u32.totalorder %s2374_s28, %s3021_s11 }
  0x3e   : > { %p2377_p8 = pnand %p2375_p11, %p2693_p12 }
  0x40   : > { %p2378_p7 = pneg %p2377_p8 }
  0x42   : > { %p2383_p13 = pnand %p2381_p3, %p2378_p7 }
  0x44   : > { %2386 = shalt.err (!%p2383_p13)
}
  0x45   : > { %s2387_s18 = scalar_lea.vmem %s556_s23, 16  ;;  %s2394_s0 = scalar_lea.vmem %s556_s23, 32 }
  0x46   : > { %p2388_p0 = scmp.ne.s32.totalorder %s556_s23, %s2387_s18  ;;  %p2395_p4 = scmp.lt.s32.totalorder %s556_s23, %s556_s23 }
  0x47   : > { %p2396_p5 = scmp.lt.s32.totalorder %s2394_s0, %s2387_s18 }
  0x48   : > { %p2390_p1 = pnand %p2388_p0, %p2693_p12 }
  0x49   : > { %p2397_p6 = por %p2396_p5, %p2395_p4 }
  0x4a   : > { %p2391_p2 = pneg %p2390_p1 }
  0x4c   : > { %p2398_p9 = pnand %p2397_p6, %p2391_p2 }
  0x4e   : > { %2401 = shalt.err (!%p2398_p9)
}
  0x4f   : > { %2248 = dma.hbm_to_vmem [thread:$0]  (!%p2681_p10), %s3021_s11, 16, %s556_s23, [#allocation10]  }
  0x50   : > { %s2510_s14 = smov [#allocation14]   ;;  %s2402_s19 = scalar_lea.hbm %s3026_s16, 256 }
  0x51   : > { %s585_s17 = sshll.u32 %s2510_s14, 4  ;;  %p2403_p11 = scmp.ne.s32.totalorder %s3026_s16, %s2402_s19  ;;  %s586_s17 = int_to_ptr.vmem [resolvable:$true] %s585_s17 }
  0x52   : > { %p2409_p3 = scmp.lt.u32.totalorder %s2402_s19, %s3026_s16 }
  0x53   : > { %p2405_p8 = pnand %p2403_p11, %p2693_p12 }
  0x55   : > { %p2406_p7 = pneg %p2405_p8 }
  0x57   : > { %p2411_p13 = pnand %p2409_p3, %p2406_p7 }
  0x59   : > { %2414 = shalt.err (!%p2411_p13)
}
  0x5a   : > { %s2415_s23 = scalar_lea.vmem %s586_s17, 256  ;;  %p2423_p4 = scmp.lt.s32.totalorder %s586_s17, %s586_s17 }
  0x5b   : > { %p2416_p0 = scmp.ne.s32.totalorder %s586_s17, %s2415_s23  ;;  %p2424_p5 = scmp.lt.s32.totalorder %s2415_s23, %s2415_s23 }
  0x5d   : > { %p2418_p1 = pnand %p2416_p0, %p2693_p12  ;;  %p2425_p6 = por %p2424_p5, %p2423_p4 }
  0x5f   : > { %p2419_p2 = pneg %p2418_p1 }
  0x61   : > { %p2426_p9 = pnand %p2425_p6, %p2419_p2 }
  0x63   : > { %2429 = shalt.err (!%p2426_p9)
}
  0x64   : > { %s2511_s13 = smov 64   ;;  %s2512_s9 = smov 4  }
  0x65   : > { %2254 = dma.hbm_to_vmem [thread:$0]  (!%p2681_p10), %s3026_s16, 256, %s586_s17, [#allocation13], %s2511_s13, %s2511_s13, %s2512_s9  }
  0x66   : > { %p2114_p11 = scmp.ge.s32.totalorder %s2506_s2, 2 }
  0x67   : > { %p3055_p8 = scmp.ne.s32.totalorder (!%p2114_p11), %s3048_s25, 0 }
  0x68   : > { %601 = sbr.rel (%p2114_p11) target bundleno = 168 (0xa8), region = 76 }
  0x6f   : > { %604 = sbr.rel (!%p3055_p8) target bundleno = 126 (0x7e), region = 80  ;;  %s606_s29 = sand.u32 (%p3055_p8), 1, %s2494_s21  }
  0x70   : > { %s2116_s28 = sshll.u32 (%p3055_p8), %s2502_s22, 2  ;;  %s2115_s24 = sshll.u32 (%p3055_p8), %s606_s29, 5 }
  0x71   : > { %s3056_s18 = sld [smem:[#allocation21_spill]] (%p3055_p8)  ;;  %s608_s30 = scalar_lea.vmem (%p3055_p8), [#allocation5], %s2115_s24 }
  0x77   : > { %s613_s0 = scalar_lea.vmem %s3056_s18, %s2116_s28 }
  0x78   : > { %v629_v0 = vld [vmem:[%s613_s0] sm:$0xf]  ;;  %v631_v1 = vld [vmem:[%s613_s0 + $0x8] sm:$0xf]  ;;  %v633_v2 = vld [vmem:[%s613_s0 + $0x10] sm:$0xf] }
  0x79   : > { %630 = vst [vmem:[%s608_s30] sm:$0xf] %v629_v0  ;;  %632 = vst [vmem:[%s608_s30 + $0x4] sm:$0xf] %v631_v1  ;;  %v635_v3 = vld [vmem:[%s613_s0 + $0x18] sm:$0xf] }
  0x7a   : > { %v637_v4 = vld [vmem:[%s613_s0 + $0x20] sm:$0xf]  ;;  %634 = vst [vmem:[%s608_s30 + $0x8] sm:$0xf] %v633_v2  ;;  %636 = vst [vmem:[%s608_s30 + $0xc] sm:$0xf] %v635_v3 }
  0x7b   : > { %638 = vst [vmem:[%s608_s30 + $0x10] sm:$0xf] %v637_v4  ;;  %v639_v5 = vld [vmem:[%s613_s0 + $0x28] sm:$0xf]  ;;  %v641_v6 = vld [vmem:[%s613_s0 + $0x30] sm:$0xf] }
  0x7c   : > { %v643_v7 = vld [vmem:[%s613_s0 + $0x38] sm:$0xf]  ;;  %640 = vst [vmem:[%s608_s30 + $0x14] sm:$0xf] %v639_v5  ;;  %642 = vst [vmem:[%s608_s30 + $0x18] sm:$0xf] %v641_v6 }
  0x7d   : > { %644 = vst [vmem:[%s608_s30 + $0x1c] sm:$0xf] %v643_v7 }
  0x7e PF: > { %p3057_p10 = scmp.ne.s32.totalorder %s3048_s25, 0 }
  0x7f   : > { %s685_s17 = sand.u32 (%p3057_p10), 1, %s2494_s21   ;;  %s2118_s23 = sshll.u32 (%p3057_p10), %s2502_s22, 2 }
  0x80   : > { %683 = sbr.rel (!%p3057_p10) target bundleno = 142 (0x8e), region = 121  ;;  %s2117_s13 = sshll.u32 (%p3057_p10), %s685_s17, 5 }
  0x81   : > { %s3058_s14 = sld [smem:[#allocation22_spill]] (%p3057_p10)  ;;  %s687_s28 = scalar_lea.vmem (%p3057_p10), [#allocation6], %s2117_s13 }
  0x87   : > { %s692_s29 = scalar_lea.vmem %s3058_s14, %s2118_s23 }
  0x88   : > { %v708_v8 = vld [vmem:[%s692_s29] sm:$0xf]  ;;  %v710_v9 = vld [vmem:[%s692_s29 + $0x8] sm:$0xf]  ;;  %v712_v10 = vld [vmem:[%s692_s29 + $0x10] sm:$0xf] }
  0x89   : > { %709 = vst [vmem:[%s687_s28] sm:$0xf] %v708_v8  ;;  %711 = vst [vmem:[%s687_s28 + $0x4] sm:$0xf] %v710_v9  ;;  %v714_v11 = vld [vmem:[%s692_s29 + $0x18] sm:$0xf] }
  0x8a   : > { %v716_v12 = vld [vmem:[%s692_s29 + $0x20] sm:$0xf]  ;;  %713 = vst [vmem:[%s687_s28 + $0x8] sm:$0xf] %v712_v10  ;;  %715 = vst [vmem:[%s687_s28 + $0xc] sm:$0xf] %v714_v11 }
  0x8b   : > { %717 = vst [vmem:[%s687_s28 + $0x10] sm:$0xf] %v716_v12  ;;  %v718_v13 = vld [vmem:[%s692_s29 + $0x28] sm:$0xf]  ;;  %v720_v14 = vld [vmem:[%s692_s29 + $0x30] sm:$0xf] }
  0x8c   : > { %v722_v15 = vld [vmem:[%s692_s29 + $0x38] sm:$0xf]  ;;  %719 = vst [vmem:[%s687_s28 + $0x14] sm:$0xf] %v718_v13  ;;  %721 = vst [vmem:[%s687_s28 + $0x18] sm:$0xf] %v720_v14 }
  0x8d   : > { %723 = vst [vmem:[%s687_s28 + $0x1c] sm:$0xf] %v722_v15 }
  0x8e PF: > { %p3059_p12 = scmp.ne.s32.totalorder %s3048_s25, 0 }
  0x8f   : > { %s764_s24 = sand.u32 (%p3059_p12), 1, %s2494_s21   ;;  %s2120_s19 = sshll.u32 (%p3059_p12), %s2502_s22, 2 }
  0x90   : > { %762 = sbr.rel (!%p3059_p12) target bundleno = 158 (0x9e), region = 162  ;;  %s2119_s15 = sshll.u32 (%p3059_p12), %s764_s24, 5 }
  0x91   : > { %s3060_s30 = sld [smem:[#allocation24_spill]] (%p3059_p12)  ;;  %s766_s23 = scalar_lea.vmem (%p3059_p12), [#allocation7], %s2119_s15 }
  0x97   : > { %s771_s17 = scalar_lea.vmem %s3060_s30, %s2120_s19 }
  0x98   : > { %v787_v16 = vld [vmem:[%s771_s17] sm:$0xf]  ;;  %v789_v17 = vld [vmem:[%s771_s17 + $0x8] sm:$0xf]  ;;  %v791_v18 = vld [vmem:[%s771_s17 + $0x10] sm:$0xf] }
  0x99   : > { %788 = vst [vmem:[%s766_s23] sm:$0xf] %v787_v16  ;;  %790 = vst [vmem:[%s766_s23 + $0x4] sm:$0xf] %v789_v17  ;;  %v793_v19 = vld [vmem:[%s771_s17 + $0x18] sm:$0xf] }
  0x9a   : > { %v795_v20 = vld [vmem:[%s771_s17 + $0x20] sm:$0xf]  ;;  %792 = vst [vmem:[%s766_s23 + $0x8] sm:$0xf] %v791_v18  ;;  %794 = vst [vmem:[%s766_s23 + $0xc] sm:$0xf] %v793_v19 }
  0x9b   : > { %796 = vst [vmem:[%s766_s23 + $0x10] sm:$0xf] %v795_v20  ;;  %v797_v21 = vld [vmem:[%s771_s17 + $0x28] sm:$0xf]  ;;  %v799_v22 = vld [vmem:[%s771_s17 + $0x30] sm:$0xf] }
  0x9c   : > { %v801_v23 = vld [vmem:[%s771_s17 + $0x38] sm:$0xf]  ;;  %798 = vst [vmem:[%s766_s23 + $0x14] sm:$0xf] %v797_v21  ;;  %800 = vst [vmem:[%s766_s23 + $0x18] sm:$0xf] %v799_v22 }
  0x9d   : > { %802 = vst [vmem:[%s766_s23 + $0x1c] sm:$0xf] %v801_v23 }
  0x9e PF: > { %p3061_p7 = scmp.ne.s32.totalorder %s3048_s25, 0 }
  0x9f   : > { %s843_s13 = sand.u32 (%p3061_p7), 1, %s2494_s21   ;;  %s2122_s9 = sshll.u32 (%p3061_p7), %s2502_s22, 2 }
  0xa0   : > { %841 = sbr.rel (!%p3061_p7) target bundleno = 168 (0xa8), region = 203  ;;  %s2121_s3 = sshll.u32 (%p3061_p7), %s843_s13, 5 }
  0xa1   : > { %s850_s28 = scalar_lea.vmem (%p3061_p7), %s3014_s4, %s2122_s9  ;;  %s845_s24 = scalar_lea.vmem (%p3061_p7), [#allocation8], %s2121_s3 }
  0xa2   : > { %v866_v24 = vld [vmem:[%s850_s28] sm:$0xf] (%p3061_p7)  ;;  %v868_v25 = vld [vmem:[%s850_s28 + $0x8] sm:$0xf] (%p3061_p7)  ;;  %v870_v26 = vld [vmem:[%s850_s28 + $0x10] sm:$0xf] (%p3061_p7) }
  0xa3   : > { %867 = vst [vmem:[%s845_s24] sm:$0xf] (%p3061_p7), %v866_v24  ;;  %869 = vst [vmem:[%s845_s24 + $0x4] sm:$0xf] (%p3061_p7), %v868_v25  ;;  %v872_v27 = vld [vmem:[%s850_s28 + $0x18] sm:$0xf] (%p3061_p7) }
  0xa4   : > { %v874_v28 = vld [vmem:[%s850_s28 + $0x20] sm:$0xf] (%p3061_p7)  ;;  %871 = vst [vmem:[%s845_s24 + $0x8] sm:$0xf] (%p3061_p7), %v870_v26  ;;  %873 = vst [vmem:[%s845_s24 + $0xc] sm:$0xf] (%p3061_p7), %v872_v27 }
  0xa5   : > { %875 = vst [vmem:[%s845_s24 + $0x10] sm:$0xf] (%p3061_p7), %v874_v28  ;;  %v876_v29 = vld [vmem:[%s850_s28 + $0x28] sm:$0xf] (%p3061_p7)  ;;  %v878_v30 = vld [vmem:[%s850_s28 + $0x30] sm:$0xf] (%p3061_p7) }
  0xa6   : > { %v880_v31 = vld [vmem:[%s850_s28 + $0x38] sm:$0xf] (%p3061_p7)  ;;  %877 = vst [vmem:[%s845_s24 + $0x14] sm:$0xf] (%p3061_p7), %v876_v29  ;;  %879 = vst [vmem:[%s845_s24 + $0x18] sm:$0xf] (%p3061_p7), %v878_v30 }
  0xa7   : > { %881 = vst [vmem:[%s845_s24 + $0x1c] sm:$0xf] %v880_v31 }
  0xa8 PF: > { %p3062_p3 = scmp.ne.s32.totalorder %s3049_s26, 0 }
  0xa9   : > { %s926_s25 = sand.u32 (!%p3062_p3), 1, %s2490_s20   ;;  %p3063_p13 = scmp.ne.s32.totalorder (!%p3062_p3), %s3050_s27, 0 }
  0xaa   : > { %923 = sbr.rel (%p3062_p3) target bundleno = 1245 (0x4dd), region = 244  ;;  %s2124_s19 = sshll.u32 (!%p3062_p3), %s926_s25, 5 }
  0xab   : > { %s2777_s15 = scalar_lea.vmem (!%p3062_p3), [#allocation5], %s2124_s19  ;;  %s2779_s18 = scalar_lea.vmem (!%p3062_p3), [#allocation6], %s2124_s19 }
  0xac   : > { %s2781_s0 = scalar_lea.vmem (!%p3062_p3), [#allocation7], %s2124_s19  ;;  %s2783_s30 = scalar_lea.vmem (!%p3062_p3), [#allocation8], %s2124_s19 }
  0xb1   : > { %2477 = dma.done.wait (%p3063_p13), [#allocation10], 16  }
  0xb2   : > { %2479 = vsyncadd (%p3063_p13), [#allocation10], 4294967280 }
  0xb3   : > { %2481 = dma.done.wait (%p3063_p13), [#allocation13], 272  }
  0xb4   : > { %2483 = vsyncadd (%p3063_p13), [#allocation13], 4294967024  ;;  %p2131_p0 = scmp.ne.s32.totalorder %s2498_s1, 0 }
  0xb5   : > { %vm1046_vm0 = vcmask (!%p2131_p0), 261120   ;;  %v2513_v32 = vmov (!%p2131_p0), 0.0  }
  0xb6   : > { %1045 = sbr.rel (%p2131_p0) target bundleno = 189 (0xbd), region = 276  ;;  %1047 = vst.msk [vmem:[#allocation2] sm:$0xff] (!%p2131_p0), %vm1046_vm0, %v2513_v32  ;;  %1048 = vst.msk [vmem:[#allocation3] sm:$0xff] (!%p2131_p0), %vm1046_vm0, %v2513_v32 }
  0xbd PF: > { %v1269_v33 = vld [vmem:[%s2783_s30] sm:$0xf]  ;;  %v2514_v35 = vmov 0   ;;  %v1270_v36 = vld [vmem:[%s2783_s30 + $0x4] sm:$0xf]  ;;  %v1074_v52 = vlaneseq  ;;  %vm1178_vm1 = vcmask 261120  }
  0xbe   : > { %v1058_v34 = vld [vmem:[%s2779_s18] sm:$0xf]  ;;  %2316 = vset.pattern.permute.xlu1 %v2514_v35  ;;  %2315 = vset.pattern.permute.xlu0 %v2514_v35  ;;  %v1059_v37 = vld [vmem:[%s2779_s18 + $0x4] sm:$0xf]  ;;  %v1271_v38 = vld [vmem:[%s2783_s30 + $0x8] sm:$0xf] }
  0xbf   : > { %1279 = vperm.xlu1 %2316, %v1269_v33   ;;  %1068 = vperm.xlu0 %2315, %v1058_v34   ;;  %v1060_v39 = vld [vmem:[%s2779_s18 + $0x8] sm:$0xf]  ;;  %v1272_v40 = vld [vmem:[%s2783_s30 + $0xc] sm:$0xf]  ;;  %v1273_v42 = vld [vmem:[%s2783_s30 + $0x10] sm:$0xf] }
  0xc0   : > { %v1061_v41 = vld [vmem:[%s2779_s18 + $0xc] sm:$0xf]  ;;  %v1062_v43 = vld [vmem:[%s2779_s18 + $0x10] sm:$0xf]  ;;  %v1274_v44 = vld [vmem:[%s2783_s30 + $0x14] sm:$0xf] }
  0xc1   : > { %v1063_v45 = vld [vmem:[%s2779_s18 + $0x14] sm:$0xf]  ;;  %v1275_v46 = vld [vmem:[%s2783_s30 + $0x18] sm:$0xf]  ;;  %v1276_v48 = vld [vmem:[%s2783_s30 + $0x1c] sm:$0xf] }
  0xc2   : > { %v1064_v47 = vld [vmem:[%s2779_s18 + $0x18] sm:$0xf]  ;;  %v1065_v49 = vld [vmem:[%s2779_s18 + $0x1c] sm:$0xf]  ;;  %v2515_v50 = vmov 839922192  }
  0xc3   : > { %1291 = vperm.xlu1 %2316, %v1270_v36   ;;  %1080 = vperm.xlu0 %2315, %v1059_v37   ;;  %v1072_v51 = vunpack.c.l.s4 %v2515_v50  ;;  %v1075_v54 = vshrl.u32 %v1074_v52, 7  ;;  %v1261_v56 = vld [vmem:[%s2781_s0] sm:$0xf]  ;;  %v1262_v0 = vld [vmem:[%s2781_s0 + $0x4] sm:$0xf]  ;;  %vm1243_vm2 = vcmask 1041409  }
  0xc4   : > { %v1050_v59 = vld [vmem:[%s2777_s15] sm:$0xf]  ;;  %v1051_v3 = vld [vmem:[%s2777_s15 + $0x4] sm:$0xf]  ;;  %v1263_v14 = vld [vmem:[%s2781_s0 + $0x8] sm:$0xf] }
  0xc5   : > { %v1073_v53 = vunpack.c.0.s8 %v1072_v51  ;;  %v1052_v17 = vld [vmem:[%s2777_s15 + $0x8] sm:$0xf]  ;;  %v1264_v30 = vld [vmem:[%s2781_s0 + $0xc] sm:$0xf]  ;;  %vm1245_vm3 = vcmask 1042434   ;;  %vm1247_vm4 = vcmask 1043459  }
  0xc6   : > { %v1053_v33 = vld [vmem:[%s2777_s15 + $0xc] sm:$0xf]  ;;  %vm1249_vm5 = vcmask 1044484   ;;  %vm1251_vm6 = vcmask 1045509   ;;  %vm1253_vm7 = vcmask 1046534   ;;  %vm1255_vm8 = vcmask 1047559  }
  0xc7   : > { %1303 = vperm.xlu1 %2316, %v1271_v38   ;;  %1092 = vperm.xlu0 %2315, %v1060_v39   ;;  %v2810_v55 = vsub.s32 %v1073_v53, %v1075_v54  ;;  %p2132_p1 = scmp.ne.s32.totalorder %s2498_s1, 1 }
  0xc8   : > { %s3064_s27 = sld [smem:[#allocation23_spill]] (!%p2132_p1)  ;;  %vm2518_vm9 = vmmov (!%p2132_p1), 0   ;;  %s3065_s23 = sld [smem:[#allocation25_spill]] (!%p2132_p1) }
  0xc9   : > { %s3066_s1 = sld [smem:[#allocation27_spill]] (!%p2132_p1)  ;;  %s1891_s18 = sld [smem:[#allocation4]] (!%p2132_p1) }
  0xca   : > { %s3069_s20 = sld [smem:[#allocation29_spill]] (!%p2132_p1) }
  0xcb   : > { %1315 = vperm.xlu1 %2316, %v1272_v40   ;;  %1104 = vperm.xlu0 %2315, %v1061_v41  }
  0xcf   : > { %1327 = vperm.xlu1 %2316, %v1273_v42   ;;  %1116 = vperm.xlu0 %2315, %v1062_v43   ;;  %s3067_s3 = smov (!%p2132_p1), %s3066_s1 }
  0xd3   : > { %1339 = vperm.xlu1 %2316, %v1274_v44   ;;  %1128 = vperm.xlu0 %2315, %v1063_v45  }
  0xd7   : > { %1351 = vperm.xlu1 %2316, %v1275_v46   ;;  %1140 = vperm.xlu0 %2315, %v1064_v47  }
  0xdb   : > { %1363 = vperm.xlu1 %2316, %v1276_v48   ;;  %1152 = vperm.xlu0 %2315, %v1065_v49  }
 0x13e   : > { %v1280_v57 = vpop.permute.xlu1 %1279  ;;  %v1069_v58 = vpop.permute.xlu0 %1068 }
 0x13f   : > { %v1288_v60 = vrot.slane %v1280_v57, %v2810_v55  ;;  %v1077_v61 = vrot.slane %v1069_v58, %v2810_v55 }
 0x141   : > { %v1373_v62 = vmul.bf16 %v1288_v60, %v1261_v56  ;;  %v1162_v63 = vmul.bf16 %v1077_v61, %v1050_v59  ;;  %v1265_v59 = vld [vmem:[%s2781_s0 + $0x10] sm:$0xf] }
 0x142   : > { %v1292_v1 = vpop.permute.xlu1 %1291  ;;  %v1081_v2 = vpop.permute.xlu0 %1080  ;;  %v1054_v60 = vld [vmem:[%s2777_s15 + $0x10] sm:$0xf] }
 0x143   : > { %v1381_v4 = vunpack.c.l.bf16 %v1373_v62  ;;  %v1170_v5 = vunpack.c.l.bf16 %v1162_v63  ;;  %v1300_v6 = vrot.slane %v1292_v1, %v2810_v55  ;;  %v1089_v7 = vrot.slane %v1081_v2, %v2810_v55 }
 0x145   : > { %v1389_v8 = vsel %vm1178_vm1, %v1381_v4, 0.0  ;;  %v1179_v9 = vsel %vm1178_vm1, %v1170_v5, 0.0  ;;  %v1374_v10 = vmul.bf16 %v1300_v6, %v1262_v0  ;;  %v1163_v11 = vmul.bf16 %v1089_v7, %v1051_v3 }
 0x146   : > { %v1390_v12 = vrot.slane %v1389_v8, 4  ;;  %v1180_v13 = vrot.slane %v1179_v9, 4  ;;  %v1304_v15 = vpop.permute.xlu1 %1303  ;;  %v1093_v16 = vpop.permute.xlu0 %1092 }
 0x147   : > { %v1382_v18 = vunpack.c.l.bf16 %v1374_v10  ;;  %v1171_v19 = vunpack.c.l.bf16 %v1163_v11  ;;  %v1312_v20 = vrot.slane %v1304_v15, %v2810_v55  ;;  %v1101_v21 = vrot.slane %v1093_v16, %v2810_v55 }
 0x148   : > { %v1391_v26 = vadd.f32 %v1390_v12, %v1389_v8  ;;  %v1181_v27 = vadd.f32 %v1180_v13, %v1179_v9 }
 0x149   : > { %v1396_v22 = vsel %vm1178_vm1, %v1382_v18, 0.0  ;;  %v1186_v23 = vsel %vm1178_vm1, %v1171_v19, 0.0  ;;  %v1375_v24 = vmul.bf16 %v1312_v20, %v1263_v14  ;;  %v1164_v25 = vmul.bf16 %v1101_v21, %v1052_v17  ;;  %v1266_v17 = vld [vmem:[%s2781_s0 + $0x14] sm:$0xf] }
 0x14a   : > { %v1397_v28 = vrot.slane %v1396_v22, 4  ;;  %v1187_v29 = vrot.slane %v1186_v23, 4  ;;  %v1316_v31 = vpop.permute.xlu1 %1315  ;;  %v1105_v32 = vpop.permute.xlu0 %1104  ;;  %v1392_v44 = vrot.slane %v1391_v26, 2  ;;  %v1182_v45 = vrot.slane %v1181_v27, 2  ;;  %v1055_v19 = vld [vmem:[%s2777_s15 + $0x14] sm:$0xf] }
 0x14b   : > { %v1383_v34 = vunpack.c.l.bf16 %v1375_v24  ;;  %v1172_v35 = vunpack.c.l.bf16 %v1164_v25  ;;  %v1324_v36 = vrot.slane %v1316_v31, %v2810_v55  ;;  %v1113_v37 = vrot.slane %v1105_v32, %v2810_v55 }
 0x14c   : > { %v1398_v38 = vadd.f32 %v1397_v28, %v1396_v22  ;;  %v1188_v39 = vadd.f32 %v1187_v29, %v1186_v23  ;;  %v1393_v57 = vadd.f32 %v1392_v44, %v1391_v26  ;;  %v1183_v58 = vadd.f32 %v1182_v45, %v1181_v27 }
 0x14d   : > { %v1403_v40 = vsel %vm1178_vm1, %v1383_v34, 0.0  ;;  %v1193_v41 = vsel %vm1178_vm1, %v1172_v35, 0.0  ;;  %v1376_v42 = vmul.bf16 %v1324_v36, %v1264_v30  ;;  %v1165_v43 = vmul.bf16 %v1113_v37, %v1053_v33 }
 0x14e   : > { %v1399_v46 = vrot.slane %v1398_v38, 2  ;;  %v1189_v47 = vrot.slane %v1188_v39, 2  ;;  %v1328_v48 = vpop.permute.xlu1 %1327  ;;  %v1117_v49 = vpop.permute.xlu0 %1116  ;;  %v1404_v52 = vrot.slane %v1403_v40, 4  ;;  %v1194_v53 = vrot.slane %v1193_v41, 4 }
 0x14f   : > { %v1384_v50 = vunpack.c.l.bf16 %v1376_v42  ;;  %v1173_v51 = vunpack.c.l.bf16 %v1165_v43  ;;  %v1336_v1 = vrot.slane %v1328_v48, %v2810_v55  ;;  %v1125_v2 = vrot.slane %v1117_v49, %v2810_v55 }
 0x150   : > { %v1400_v54 = vadd.f32 %v1399_v46, %v1398_v38  ;;  %v1190_v56 = vadd.f32 %v1189_v47, %v1188_v39  ;;  %v1405_v3 = vadd.f32 %v1404_v52, %v1403_v40  ;;  %v1195_v4 = vadd.f32 %v1194_v53, %v1193_v41  ;;  %v1267_v39 = vld [vmem:[%s2781_s0 + $0x18] sm:$0xf] }
 0x151   : > { %v1410_v63 = vsel %vm1178_vm1, %v1384_v50, 0.0  ;;  %v1200_v0 = vsel %vm1178_vm1, %v1173_v51, 0.0  ;;  %v1377_v7 = vmul.bf16 %v1336_v1, %v1265_v59  ;;  %v1166_v8 = vmul.bf16 %v1125_v2, %v1054_v60  ;;  %v1056_v40 = vld [vmem:[%s2777_s15 + $0x18] sm:$0xf] }
 0x152   : > { %v1340_v61 = vpop.permute.xlu1 %1339  ;;  %v1129_v62 = vpop.permute.xlu0 %1128  ;;  %v1401_v5 = vrot.slane %v1400_v54, 1  ;;  %v1191_v6 = vrot.slane %v1190_v56, 1  ;;  %v1411_v9 = vrot.slane %v1410_v63, 4  ;;  %v1201_v10 = vrot.slane %v1200_v0, 4 }
 0x153   : > { %v1394_v11 = vrot.slane %v1393_v57, 1  ;;  %v1184_v12 = vrot.slane %v1183_v58, 1  ;;  %v1385_v13 = vunpack.c.l.bf16 %v1377_v7  ;;  %v1174_v14 = vunpack.c.l.bf16 %v1166_v8 }
 0x154   : > { %v1406_v15 = vrot.slane %v1405_v3, 2  ;;  %v1196_v16 = vrot.slane %v1195_v4, 2  ;;  %v1348_v18 = vrot.slane %v1340_v61, %v2810_v55  ;;  %v1137_v20 = vrot.slane %v1129_v62, %v2810_v55  ;;  %v1057_v61 = vld [vmem:[%s2777_s15 + $0x1c] sm:$0xf]  ;;  %s3068_s15 = sld [smem:[#allocation28_spill]] (!%p2132_p1) }
 0x155   : > { %v1402_v23 = vadd.f32 %v1401_v5, %v1400_v54  ;;  %v1192_v24 = vadd.f32 %v1191_v6, %v1190_v56  ;;  %v1417_v25 = vsel %vm1178_vm1, %v1385_v13, 0.0  ;;  %v1207_v26 = vsel %vm1178_vm1, %v1174_v14, 0.0  ;;  %v1268_v56 = vld [vmem:[%s2781_s0 + $0x1c] sm:$0xf] }
 0x156   : > { %v1352_v21 = vpop.permute.xlu1 %1351  ;;  %v1141_v22 = vpop.permute.xlu0 %1140  ;;  %v1412_v27 = vadd.f32 %v1411_v9, %v1410_v63  ;;  %v1202_v28 = vadd.f32 %v1201_v10, %v1200_v0  ;;  %v1418_v29 = vrot.slane %v1417_v25, 4  ;;  %v1208_v30 = vrot.slane %v1207_v26, 4 }
 0x157   : > { %v1395_v31 = vadd.f32 %v1394_v11, %v1393_v57  ;;  %v1185_v32 = vadd.f32 %v1184_v12, %v1183_v58  ;;  %v1378_v33 = vmul.bf16 %v1348_v18, %v1266_v17  ;;  %v1167_v34 = vmul.bf16 %v1137_v20, %v1055_v19 }
 0x158   : > { %v2846_v35 = vadd.f32 %v1406_v15, %v1405_v3  ;;  %v2848_v36 = vadd.f32 %v1196_v16, %v1195_v4  ;;  %v1419_v37 = vadd.f32 %v1418_v29, %v1417_v25  ;;  %v1209_v38 = vadd.f32 %v1208_v30, %v1207_v26 }
 0x159   : > { %v1386_v41 = vunpack.c.l.bf16 %v1378_v33  ;;  %v1175_v42 = vunpack.c.l.bf16 %v1167_v34  ;;  %v1360_v43 = vrot.slane %v1352_v21, %v2810_v55  ;;  %v1149_v44 = vrot.slane %v1141_v22, %v2810_v55 }
 0x15a   : > { %v2855_v45 = vsel %vm1243_vm2, %v1402_v23, %v1395_v31  ;;  %v2858_v46 = vsel %vm1243_vm2, %v1192_v24, %v1185_v32  ;;  %v1413_v47 = vrot.slane %v1412_v27, 2  ;;  %v1203_v48 = vrot.slane %v1202_v28, 2  ;;  %v1364_v49 = vpop.permute.xlu1 %1363  ;;  %v1153_v50 = vpop.permute.xlu0 %1152 }
 0x15b   : > { %v1424_v51 = vsel %vm1178_vm1, %v1386_v41, 0.0  ;;  %v1214_v52 = vsel %vm1178_vm1, %v1175_v42, 0.0  ;;  %v1379_v53 = vmul.bf16 %v1360_v43, %v1267_v39  ;;  %v1168_v54 = vmul.bf16 %v1149_v44, %v1056_v40 }
 0x15c   : > { %v1420_v57 = vrot.slane %v1419_v37, 2  ;;  %v1210_v58 = vrot.slane %v1209_v38, 2  ;;  %v1425_v59 = vrot.slane %v1424_v51, 4  ;;  %v1215_v60 = vrot.slane %v1214_v52, 4 }
 0x15d   : > { %v1387_v62 = vunpack.c.l.bf16 %v1379_v53  ;;  %v1176_v63 = vunpack.c.l.bf16 %v1168_v54  ;;  %v1372_v0 = vrot.slane %v1364_v49, %v2810_v55  ;;  %v1161_v1 = vrot.slane %v1153_v50, %v2810_v55 }
 0x15e   : > { %v1414_v2 = vadd.f32 %v1413_v47, %v1412_v27  ;;  %v1204_v3 = vadd.f32 %v1203_v48, %v1202_v28  ;;  %v1426_v4 = vadd.f32 %v1425_v59, %v1424_v51  ;;  %v1216_v5 = vadd.f32 %v1215_v60, %v1214_v52 }
 0x15f   : > { %v1431_v6 = vsel %vm1178_vm1, %v1387_v62, 0.0  ;;  %v1221_v7 = vsel %vm1178_vm1, %v1176_v63, 0.0  ;;  %v1380_v8 = vmul.bf16 %v1372_v0, %v1268_v56  ;;  %v1169_v9 = vmul.bf16 %v1161_v1, %v1057_v61 }
 0x160   : > { %v1421_v10 = vadd.f32 %v1420_v57, %v1419_v37  ;;  %v1211_v11 = vadd.f32 %v1210_v58, %v1209_v38  ;;  %v1427_v12 = vrot.slane %v1426_v4, 2  ;;  %v1217_v13 = vrot.slane %v1216_v5, 2 }
 0x161   : > { %v1432_v14 = vrot.slane %v1431_v6, 4  ;;  %v1222_v15 = vrot.slane %v1221_v7, 4  ;;  %v1388_v16 = vunpack.c.l.bf16 %v1380_v8  ;;  %v1177_v55 = vunpack.c.l.bf16 %v1169_v9 }
 0x162   : > { %v1408_v17 = vrot.slane %v2846_v35, 1  ;;  %v1198_v18 = vrot.slane %v2848_v36, 1  ;;  %v1428_v19 = vadd.f32 %v1427_v12, %v1426_v4  ;;  %v1218_v20 = vadd.f32 %v1217_v13, %v1216_v5  ;;  %v1468_v12 = vld [vmem:[%s3064_s27] sm:$0xff] (!%p2132_p1) }
 0x163   : > { %v1433_v21 = vadd.f32 %v1432_v14, %v1431_v6  ;;  %v1223_v22 = vadd.f32 %v1222_v15, %v1221_v7  ;;  %v1438_v23 = vsel %vm1178_vm1, %v1388_v16, 0.0  ;;  %v1228_v24 = vsel %vm1178_vm1, %v1177_v55, 0.0  ;;  %v1544_v14 = vld [vmem:[%s3015_s5] sm:$0xff] (!%p2132_p1)  ;;  %v2319_v55 = vld [vmem:[%s3016_s6 + $0x8] sm:$0xff] (!%p2132_p1)  }
 0x164   : > { %v1415_v25 = vrot.slane %v1414_v2, 1  ;;  %v1205_v26 = vrot.slane %v1204_v3, 1  ;;  %v1439_v27 = vrot.slane %v1438_v23, 4  ;;  %v1229_v28 = vrot.slane %v1228_v24, 4  ;;  %v2318_v16 = vld [vmem:[%s3016_s6] sm:$0xff] (!%p2132_p1)  }
 0x165   : > { %v1422_v29 = vrot.slane %v1421_v10, 1  ;;  %v1212_v30 = vrot.slane %v1211_v11, 1  ;;  %v1434_v31 = vrot.slane %v1433_v21, 2  ;;  %v1224_v32 = vrot.slane %v1223_v22, 2 }
 0x166   : > { %v1429_v33 = vrot.slane %v1428_v19, 1  ;;  %v1219_v34 = vrot.slane %v1218_v20, 1  ;;  %v1440_v37 = vadd.f32 %v1439_v27, %v1438_v23  ;;  %v1230_v38 = vadd.f32 %v1229_v28, %v1228_v24  ;;  %v2322_v27 = vld [vmem:[%s3020_s10] sm:$0xff] (!%p2132_p1)   ;;  %v2323_v28 = vld [vmem:[%s3020_s10 + $0x8] sm:$0xff] (!%p2132_p1)  }
 0x167   : > { %v1409_v39 = vadd.f32 %v1408_v17, %v2846_v35  ;;  %v1199_v40 = vadd.f32 %v1198_v18, %v2848_v36  ;;  %v1435_v41 = vadd.f32 %v1434_v31, %v1433_v21  ;;  %v1225_v42 = vadd.f32 %v1224_v32, %v1223_v22  ;;  %v2320_v17 = vld [vmem:[%s3018_s8] sm:$0xff] (!%p2132_p1)   ;;  %v2321_v18 = vld [vmem:[%s3018_s8 + $0x8] sm:$0xff] (!%p2132_p1)  }
 0x168   : > { %v1416_v43 = vadd.f32 %v1415_v25, %v1414_v2  ;;  %v1206_v44 = vadd.f32 %v1205_v26, %v1204_v3  ;;  %v1441_v47 = vrot.slane %v1440_v37, 2  ;;  %v1231_v48 = vrot.slane %v1230_v38, 2  ;;  %v1260_v3 = vld [vmem:[#allocation3] sm:$0xff] }
 0x169   : > { %v1423_v49 = vadd.f32 %v1422_v29, %v1421_v10  ;;  %v1213_v50 = vadd.f32 %v1212_v30, %v1211_v11  ;;  %v1436_v51 = vrot.slane %v1435_v41, 1  ;;  %v1226_v52 = vrot.slane %v1225_v42, 1  ;;  %v2326_v29 = vld [vmem:[%s3022_s12] sm:$0xff] (!%p2132_p1)  }
 0x16a   : > { %v1430_v53 = vadd.f32 %v1429_v33, %v1428_v19  ;;  %v1220_v54 = vadd.f32 %v1219_v34, %v1218_v20  ;;  %v1442_v56 = vadd.f32 %v1441_v47, %v1440_v37  ;;  %v1232_v57 = vadd.f32 %v1231_v48, %v1230_v38  ;;  %v2133_v30 = vld [vmem:[%s3017_s7] ss:$0 sm:$0xff] (!%p2132_p1) }
 0x16b   : > { %v1454_v58 = vsel %vm1245_vm3, %v1409_v39, %v2855_v45  ;;  %v1246_v35 = vsel %vm1245_vm3, %v1199_v40, %v2858_v46  ;;  %v1437_v36 = vadd.f32 %v1436_v51, %v1435_v41  ;;  %v1227_v59 = vadd.f32 %v1226_v52, %v1225_v42  ;;  %v1049_v46 = vld [vmem:[#allocation2] sm:$0xff]  ;;  %v2327_v52 = vld [vmem:[%s3022_s12 + $0x8] sm:$0xff] (!%p2132_p1)  }
 0x16c   : > { %v1455_v60 = vsel %vm1247_vm4, %v1416_v43, %v1454_v58  ;;  %v1248_v61 = vsel %vm1247_vm4, %v1206_v44, %v1246_v35  ;;  %v1443_v62 = vrot.slane %v1442_v56, 1  ;;  %v1233_v63 = vrot.slane %v1232_v57, 1  ;;  %v2137_v37 = vld [vmem:[%s3065_s23] ss:$0 sm:$0xff] (!%p2132_p1) }
 0x16d   : > { %v1456_v0 = vsel %vm1249_vm5, %v1423_v49, %v1455_v60  ;;  %v1250_v1 = vsel %vm1249_vm5, %v1213_v50, %v1248_v61  ;;  %1466 = sbr.rel (%p2132_p1) target bundleno = 1214 (0x4be), region = 280  ;;  %v2516_v13 = vmov (!%p2132_p1), 0   ;;  %v2517_v15 = vmov (!%p2132_p1), 0.0   ;;  %v2324_v47 = vld [vmem:[%s3066_s1] sm:$0xff] (!%p2132_p1)   ;;  %v2325_v49 = vld [vmem:[%s3067_s3 + $0x8] sm:$0xff] (!%p2132_p1)  }
 0x16e   : > { %v1457_v2 = vsel %vm1251_vm6, %v1430_v53, %v1456_v0  ;;  %v1252_v45 = vsel %vm1251_vm6, %v1220_v54, %v1250_v1  ;;  %v1444_v4 = vadd.f32 %v1443_v62, %v1442_v56  ;;  %v1234_v5 = vadd.f32 %v1233_v63, %v1232_v57  ;;  %2317 = vset.pattern.permute.xlu0 (!%p2132_p1), %v2516_v13  ;;  %v2141_v53 = vld [vmem:[#allocation9] ss:$0 sm:$0xff] (!%p2132_p1)  ;;  %v2149_v61 = vld [vmem:[%s3068_s15] ss:$0 sm:$0xff] (!%p2132_p1) }
 0x16f   : > { %v1458_v6 = vsel %vm1253_vm7, %v1437_v36, %v1457_v2  ;;  %v1254_v7 = vsel %vm1253_vm7, %v1227_v59, %v1252_v45  ;;  %2181 = vmatprep.subr.bf16.mxu0 (!%p2132_p1), %v2517_v15  ;;  %1471 = vperm.xlu0 (!%p2132_p1), %2317, %v1468_v12   ;;  %v2328_v59 = vld [vmem:[#allocation14] sm:$0xff] (!%p2132_p1)   ;;  %v2329_v63 = vld [vmem:[#allocation14 + $0x8] sm:$0xff] (!%p2132_p1)  }
 0x170   : > { %v1459_v8 = vsel %vm1255_vm8, %v1444_v4, %v1458_v6  ;;  %v1256_v9 = vsel %vm1255_vm8, %v1234_v5, %v1254_v7  ;;  %2189 = vmatprep.subr.bf16.mxu1 (!%p2132_p1), %v2517_v15  ;;  %2182 = vmatpush3.bf16.msra.mxu0 (!%p2132_p1), %v2318_v16  ;;  %v2153_v13 = vld [vmem:[%s3069_s20] ss:$0 sm:$0xff] (!%p2132_p1) }
 0x171   : > { %v1461_v10 = vadd.f32 %v1459_v8, %v1260_v3  ;;  %v1258_v11 = vadd.f32 %v1256_v9, %v1049_v46  ;;  %2183 = vmatprep.subr.bf16.mxu0 (!%p2132_p1), %v2517_v15  ;;  %2190 = vmatpush3.bf16.msra.mxu1 (!%p2132_p1), %v2320_v17  ;;  %v2145_v46 = vld [vmem:[#allocation12] ss:$0 sm:$0xff] (!%p2132_p1)  ;;  %v1902_v8 = vstv (!%p2132_p1), %s1891_s18 }
 0x172   : > { %2185 = vmatprep.mubr.msk.bf16.mxu0 (!%p2132_p1), %vm2518_vm9, %v2517_v15  ;;  %2191 = vmatprep.subr.bf16.mxu1 (!%p2132_p1), %v2517_v15 }
 0x173   : > { %1462 = vst.msk [vmem:[#allocation3] sm:$0xff] %vm1178_vm1, %v1461_v10  ;;  %1259 = vst.msk [vmem:[#allocation2] sm:$0xff] %vm1178_vm1, %v1258_v11  ;;  %1547 = vperm.xlu0 (!%p2132_p1), %2317, %v1544_v14   ;;  %2193 = vmatprep.mubr.msk.bf16.mxu1 (!%p2132_p1), %vm2518_vm9, %v2517_v15 }
 0x174   : > { %2184 = vmatpush3.bf16.msra.mxu0 %v2319_v55 }
 0x175   : > { %2197 = vmatprep.subr.bf16.mxu0 %v2517_v15  ;;  %2192 = vmatpush3.bf16.msra.mxu1 %v2321_v18 }
 0x176   : > { %2205 = vmatprep.subr.bf16.mxu1 %v2517_v15 }
 0x17a   : > { %v1467_v19 = vld [vmem:[#allocation2] sm:$0xff]  ;;  %v1543_v22 = vld [vmem:[#allocation3] sm:$0xff] }
 0x1ee   : > { %v1472_v20 = vpop.permute.xlu0 %1471 }
 0x1ef   : > { %v1474_v21 = vmul.f32 %v1472_v20, %v1467_v19 }
 0x1f1   : > { %v1475_v23 = vpack.c.bf16 %v1474_v21, %v1474_v21 }
 0x1f2   : > { %v1548_v24 = vpop.permute.xlu0 %1547 }
 0x1f3   : > { %v1550_v25 = vmul.f32 %v1548_v24, %v1543_v22  ;;  %2186 = vmatmul.mubr.msk.bf16.vlgmr.msra.gmra.mrb[0].mxu0 %vm1178_vm1, %v1475_v23 }
 0x1f4   : > { %2201 = vmatprep.mubr.msk.bf16.mxu0 %vm2518_vm9, %v2517_v15  ;;  %2198 = vmatpush3.bf16.msra.mxu0 %v2322_v27 }
 0x1f5   : > { %v1551_v26 = vpack.c.bf16 %v1550_v25, %v1550_v25  ;;  %2199 = vmatprep.subr.bf16.mxu0 %v2517_v15 }
 0x1f7   : > { %2194 = vmatmul.mubr.msk.bf16.vlgmr.msra.gmra.mrb[0].mxu1 %vm1178_vm1, %v1551_v26 }
 0x1f8   : > { %2209 = vmatprep.mubr.msk.bf16.mxu1 %vm2518_vm9, %v2517_v15  ;;  %2200 = vmatpush3.bf16.msra.mxu0 %v2323_v28 }
 0x1f9   : > { %2213 = vmatprep.subr.bf16.mxu0 %v2517_v15  ;;  %2206 = vmatpush3.bf16.msra.mxu1 %v2326_v29 }
 0x1fa   : > { %2207 = vmatprep.subr.bf16.mxu1 %v2517_v15 }
 0x1fd   : > { %2208 = vmatpush3.bf16.msra.mxu1 %v2327_v52 }
 0x1fe   : > { %2221 = vmatprep.subr.bf16.mxu1 %v2517_v15 }
 0x2c6   : > { %v1536_v31 = vpop.f32.mrb[0].mxu0 }
 0x2c7   : > { %v1537_v32 = vadd.f32 %v2133_v30, %v1536_v31  ;;  %v2187_v33 = vpop.f32.mrb[1].mxu0 }
 0x2c8   : > { %v1539_v34 = vpop.f32.mrb[2].mxu0 }
 0x2c9   : > { %2330 = vtanh.f32 %v1537_v32  ;;  %v2188_v38 = vpop.f32.mrb[3].mxu0 }
 0x2ca   : > { %v1612_v39 = vpop.f32.mrb[0].mxu1 }
 0x2cb   : > { %v1613_v40 = vadd.f32 %v2137_v37, %v1612_v39  ;;  %v2195_v41 = vpop.f32.mrb[1].mxu1 }
 0x2cc   : > { %v1615_v42 = vpop.f32.mrb[2].mxu1 }
 0x2cd   : > { %v2196_v43 = vpop.f32.mrb[3].mxu1  ;;  %2332 = vtanh.f32 %v1613_v40 }
 0x2d3   : > { %v2331_v44 = vpop.eup %2330 }
 0x2d4   : > { %v1619_v48 = vpack.c.bf16 %v2331_v44, %v2331_v44 }
 0x2d6   : > { %2202 = vmatmul.mubr.msk.bf16.vlgmr.msra.gmra.mrb[4].mxu0 %vm1178_vm1, %v1619_v48 }
 0x2d7   : > { %2214 = vmatpush3.bf16.msra.mxu0 %v2324_v47  ;;  %2217 = vmatprep.mubr.msk.bf16.mxu0 %vm2518_vm9, %v2517_v15  ;;  %v2333_v50 = vpop.eup %2332 }
 0x2d8   : > { %2215 = vmatprep.subr.bf16.mxu0 %v2517_v15  ;;  %v1755_v51 = vpack.c.bf16 %v2333_v50, %v2333_v50 }
 0x2db   : > { %2216 = vmatpush3.bf16.msra.mxu0 %v2325_v49 }
 0x2de   : > { %2218 = vmatmul.mubr.msk.bf16.vlgmr.msra.gmra.mrb[8].mxu0 %vm1178_vm1, %v1755_v51 }
 0x3a9   : > { %v1680_v54 = vpop.f32.mrb[4].mxu0 }
 0x3aa   : > { %v1681_v56 = vadd.f32 %v2141_v53, %v1680_v54  ;;  %v2203_v57 = vpop.f32.mrb[5].mxu0 }
 0x3ab   : > { %v1683_v58 = vpop.f32.mrb[6].mxu0 }
 0x3ac   : > { %v1686_v35 = vmax.f32 %v1681_v56, 0.0  ;;  %v2204_v36 = vpop.f32.mrb[7].mxu0 }
 0x3ae   : > { %v1687_v60 = vpack.c.bf16 %v1686_v35, %v1686_v35 }
 0x3b0   : > { %2210 = vmatmul.mubr.msk.bf16.vlgmr.msra.gmra.mrb[4].mxu1 %vm1178_vm1, %v1687_v60 }
 0x3b1   : > { %2222 = vmatpush3.bf16.msra.mxu1 %v2328_v59  ;;  %v1816_v62 = vpop.f32.mrb[8].mxu0  ;;  %2225 = vmatprep.mubr.msk.bf16.mxu1 %vm2518_vm9, %v2517_v15 }
 0x3b2   : > { %v1817_v0 = vadd.f32 %v2149_v61, %v1816_v62  ;;  %v2219_v1 = vpop.f32.mrb[9].mxu0  ;;  %2223 = vmatprep.subr.bf16.mxu1 %v2517_v15 }
 0x3b3   : > { %v1819_v2 = vpop.f32.mrb[10].mxu0 }
 0x3b4   : > { %v1822_v45 = vmax.f32 %v1817_v0, 0.0  ;;  %v2220_v3 = vpop.f32.mrb[11].mxu0 }
 0x3b5   : > { %2224 = vmatpush3.bf16.msra.mxu1 %v2329_v63 }
 0x3b6   : > { %v1823_v4 = vpack.c.bf16 %v1822_v45, %v1822_v45 }
 0x3b8   : > { %2226 = vmatmul.mubr.msk.bf16.vlgmr.msra.gmra.mrb[8].mxu1 %vm1178_vm1, %v1823_v4 }
 0x483   : > { %v1748_v5 = vpop.f32.mrb[4].mxu1 }
 0x484   : > { %v1749_v6 = vadd.f32 %v2145_v46, %v1748_v5  ;;  %v2211_v7 = vpop.f32.mrb[5].mxu1 }
 0x485   : > { %v1751_v9 = vpop.f32.mrb[6].mxu1 }
 0x486   : > { %v1754_v10 = vmax.f32 %v1749_v6, 0.0  ;;  %v2212_v11 = vpop.f32.mrb[7].mxu1 }
 0x488   : > { %v1903_v12 = vadd.f32 %v1902_v8, %v1754_v10  ;;  %1914 = vst [vmem:[#allocation15] sm:$0xff] %v1754_v10 }
 0x48a   : > { %v2158_v14 = vmul.f32 -1.442695, %v1903_v12 }
 0x48b   : > { %v1884_v15 = vpop.f32.mrb[8].mxu1 }
 0x48c   : > { %2334 = vpow2.f32 %v2158_v14  ;;  %v1885_v16 = vadd.f32 %v2153_v13, %v1884_v15  ;;  %v2227_v55 = vpop.f32.mrb[9].mxu1 }
 0x48d   : > { %v1887_v17 = vpop.f32.mrb[10].mxu1 }
 0x48e   : > { %v1890_v18 = vmax.f32 %v1885_v16, 0.0  ;;  %v2228_v19 = vpop.f32.mrb[11].mxu1 }
 0x490   : > { %v1892_v20 = vadd.f32 %v1890_v18, %v1754_v10 }
 0x492   : > { %v2157_v21 = vmul.f32 -1.442695, %v1892_v20 }
 0x494   : > { %2336 = vpow2.f32 %v2157_v21 }
 0x496   : > { %v2335_v22 = vpop.eup %2334 }
 0x497   : > { %v1907_v23 = vadd.f32 1.0, %v2335_v22 }
 0x499   : > { %2338 = vrcp.f32 %v1907_v23 }
 0x49e   : > { %v2337_v24 = vpop.eup %2336 }
 0x49f   : > { %v1896_v25 = vadd.f32 1.0, %v2337_v24 }
 0x4a1   : > { %2340 = vrcp.f32 %v1896_v25 }
 0x4a3   : > { %v2339_v26 = vpop.eup %2338 }
 0x4a4   : > { %v1910_v27 = vadd.f32 1e-08, %v2339_v26 }
 0x4a6   : > { %2342 = vlog2.f32 %v1910_v27 }
 0x4ab   : > { %v2341_v28 = vpop.eup %2340 }
 0x4ac   : > { %v1899_v29 = vadd.f32 1e-08, %v2341_v28 }
 0x4ae   : > { %2344 = vlog2.f32 %v1899_v29 }
 0x4b0   : > { %v2343_v30 = vpop.eup %2342 }
 0x4b1   : > { %v1912_v31 = vmul.f32 0.6931472, %v2343_v30 }
 0x4b3   : > { %1916 = vst [vmem:[#allocation15 + $0x10] sm:$0xff] %v1912_v31 }
 0x4b8   : > { %v2345_v32 = vpop.eup %2344 }
 0x4b9   : > { %v1901_v33 = vmul.f32 0.6931472, %v2345_v32 }
 0x4bb   : > { %v1913_v34 = vsub.f32 %v1901_v33, %v1912_v31  ;;  %1915 = vst [vmem:[#allocation15 + $0x8] sm:$0xff] %v1901_v33 }
 0x4bd   : > { %1917 = vst [vmem:[#allocation15 + $0x18] sm:$0xff] %v1913_v34 }
 0x4be PF: > { %s3070_s26 = sadd.s32 4294967295, %s2506_s2   ;;  %s2519_s17 = smov [#allocation15]  }
 0x4bf   : > { %p2969_p2 = scmp.eq.s32.totalorder %s3070_s26, 1  ;;  %s1928_s23 = sshll.u32 %s2519_s17, 4  ;;  %s1929_s23 = int_to_ptr.vmem [resolvable:$true] %s1928_s23 }
 0x4c0   : > { %s2430_s13 = scalar_lea.vmem %s1929_s23, 512  ;;  %p2437_p9 = scmp.lt.s32.totalorder %s1929_s23, %s1929_s23 }
 0x4c1   : > { %p2431_p4 = scmp.ne.s32.totalorder %s1929_s23, %s2430_s13  ;;  %p2438_p11 = scmp.lt.s32.totalorder %s2430_s13, %s2430_s13 }
 0x4c3   : > { %p2432_p5 = pnand %p2431_p4, %p2969_p2  ;;  %p2439_p8 = por %p2438_p11, %p2437_p9 }
 0x4c5   : > { %p2433_p6 = pneg %p2432_p5 }
 0x4c7   : > { %p2440_p10 = pnand %p2439_p8, %p2433_p6 }
 0x4c9   : > { %2443 = shalt.err (!%p2440_p10)
}
 0x4ca   : > { %s3072_s14 = sld [smem:[#allocation30_spill]] }
 0x4d0   : > { %s2444_s29 = scalar_lea.hbm %s3072_s14, 512 }
 0x4d1   : > { %p2445_p12 = scmp.ne.s32.totalorder %s3072_s14, %s2444_s29  ;;  %p2450_p13 = scmp.lt.u32.totalorder %s2444_s29, %s3072_s14 }
 0x4d3   : > { %p2446_p7 = pnand %p2445_p12, %p2969_p2 }
 0x4d5   : > { %p2447_p3 = pneg %p2446_p7 }
 0x4d7   : > { %p2452_p0 = pnand %p2450_p13, %p2447_p3 }
 0x4d9   : > { %2455 = shalt.err (!%p2452_p0)
}
 0x4da   : > { %2242 = dma.vmem_to_hbm [thread:$0]  (%p2969_p2), %s1929_s23, 512, %s3072_s14, [#allocation11]  }
 0x4db   : > { %2485 = dma.done.wait (%p2969_p2), [#allocation11], 512  }
 0x4dc   : > { %2487 = vsyncadd (%p2969_p2), [#allocation11], 4294966784 }
 0x4dd PF: > { %s33_s2 = sadd.s32 1, %s2506_s2   ;;  %s3073_s0 = sld [smem:[#allocation20_spill]] }
 0x4de   : > { %p30_p1 = scmp.ge.s32.totalorder %s33_s2, 4   ;;  %s3074_s30 = sld [smem:[#allocation19_spill]] }
 0x4df   : > { %s3075_s20 = smov %s2494_s21  ;;  %s3077_s1 = smov %s2502_s22 }
 0x4e0   :  { %32 = sbr.rel (!%p30_p1) target bundleno = 17 (0x11), region = 344 }
 0x4e3   : > { %s3076_s21 = smov %s3073_s0 }
 0x4e4   : > { %s3078_s22 = smov %s3074_s30 }
 0x4e7   :  { %1941 = vsyncpa [#allocation10], 1 }
 0x4e8   :  { %1943 = vsyncpa [#allocation10 + $0x1], 1 }
 0x4e9   :  { %1944 = vsyncpa [#allocation13], 1 }
 0x4ea   :  { %1945 = vsyncpa [#allocation11], 1 }
 0x4eb   :  { %1947 = vsyncpa [#allocation11 + $0x1], 1 }

</bundles_post_ra>
